<compile_context>
chip_gen: v7x
topology: tpu7x:2x2x1
jax: 0.10.0
libtpu: 0.0.40
codegen_flags: <defaults>
</compile_context>

<pallas_src>
import jax
import jax.numpy as jnp
from jax import lax
from jax.experimental import pallas as pl
from jax.experimental.pallas import tpu as pltpu

# (in_features, out_features) per layer, matching the PyTorch module.
LAYER_DIMS = [(1, 20), (20, 64), (64, 128), (128, 64), (64, 1)]


def _make_mlp_kernel(nchunks, chunk):
    """Kernel over one (1, tb) batch tile, processed in `nchunks` lane chunks."""

    def mlp_kernel(x_ref,
                   w1_ref, b1_ref,
                   w2_ref, b2_ref,
                   w3_ref, b3_ref,
                   w4_ref, b4_ref,
                   w5_ref, b5_ref,
                   o_ref):
        # Hoist the tiny weight/bias loads out of the batch-chunk loop.
        w1 = w1_ref[...]; b1 = b1_ref[...]
        w2 = w2_ref[...]; b2 = b2_ref[...]
        w3 = w3_ref[...]; b3 = b3_ref[...]
        w4 = w4_ref[...]; b4 = b4_ref[...]
        w5 = w5_ref[...]; b5 = b5_ref[...]

        def body(c, carry):
            s = pl.multiple_of(c * chunk, chunk)
            x = x_ref[:, pl.ds(s, chunk)]                       # (1, chunk) f32

            # Layer 1 (K=1): VPU broadcast outer-product, not a degenerate matmul.
            h = jnp.maximum(w1 * x + b1, 0.0)                   # (20, chunk) f32

            # Layers 2-4 on the MXU: batch on the lane/N dim, f32 accumulation.
            h = jnp.maximum(
                jnp.dot(w2, h.astype(w2.dtype),
                        preferred_element_type=jnp.float32) + b2, 0.0)   # (64, chunk)
            h = jnp.maximum(
                jnp.dot(w3, h.astype(w3.dtype),
                        preferred_element_type=jnp.float32) + b3, 0.0)   # (128, chunk)
            h = jnp.maximum(
                jnp.dot(w4, h.astype(w4.dtype),
                        preferred_element_type=jnp.float32) + b4, 0.0)   # (64, chunk)

            # Layer 5: (1, 64) @ (64, chunk) -> lane-dense (1, chunk) store.
            o_ref[:, pl.ds(s, chunk)] = (
                jnp.dot(w5, h.astype(w5.dtype),
                        preferred_element_type=jnp.float32) + b5
            ).astype(o_ref.dtype)
            return carry

        lax.fori_loop(0, nchunks, body, 0, unroll=True)

    return mlp_kernel


def _round_up(v, m):
    return ((v + m - 1) // m) * m


def _choose_tb(n, chunk, max_tb=4096):
    # >= 2 grid steps (so both v7x TensorCores get work), a multiple of `chunk`
    # lanes, capped at 4096 (largest intermediate per chunk is tiny anyway).
    tb = _round_up(pl.cdiv(n, 2), chunk)
    return max(chunk, min(max_tb, tb))


def line_forward(x, params, *, tb=None, chunk=256, use_bf16=False):
    """x: (N, 1) float32.  params: list of (W(out,in), b(out,)) in PyTorch layout."""
    n = x.shape[0]
    if tb is None:
        tb = _choose_tb(n, chunk)
    assert tb % chunk == 0 and tb % 128 == 0
    n_pad = pl.cdiv(n, tb) * tb

    # Batch on the lane (last) axis.  reshape of an (N, 1) array is a
    # layout-preserving bitcast (unlike transpose); pad only when needed.
    xt = x.reshape(1, n)
    if n_pad != n:
        xt = jnp.pad(xt, ((0, 0), (0, n_pad - n)))

    mm_dtype = jnp.bfloat16 if use_bf16 else jnp.float32
    flat_params = []
    param_specs = []
    for li, (w, b) in enumerate(params):
        if li > 0:                      # layer 1 stays f32 (VPU path)
            w = w.astype(mm_dtype)
        b_col = b.reshape(-1, 1)        # (out, 1) column, broadcasts over lanes
        flat_params += [w, b_col]
        param_specs += [pl.BlockSpec(w.shape, lambda i: (0, 0)),
                        pl.BlockSpec(b_col.shape, lambda i: (0, 0))]

    flops_per_sample = 2 * sum(din * dout for din, dout in LAYER_DIMS)
    param_bytes = sum(int(p.size) * p.dtype.itemsize for p in flat_params)
    cost = pl.CostEstimate(
        flops=flops_per_sample * n_pad,
        transcendentals=0,
        bytes_accessed=8 * n_pad + param_bytes)

    out_t = pl.pallas_call(
        _make_mlp_kernel(tb // chunk, chunk),
        out_shape=jax.ShapeDtypeStruct((1, n_pad), x.dtype),
        grid=(n_pad // tb,),
        in_specs=[pl.BlockSpec((1, tb), lambda i: (0, i))] + param_specs,
        out_specs=pl.BlockSpec((1, tb), lambda i: (0, i)),
        compiler_params=pltpu.CompilerParams(
            dimension_semantics=("parallel",)),
        cost_estimate=cost,
    )(xt, *flat_params)

    out = out_t.reshape(n_pad, 1)       # layout-preserving, no transpose copy
    if n_pad != n:
        out = out[:n]
    return out


def init_params(key):
    """PyTorch nn.Linear default init; W stored as (out, in), b as (out,)."""
    params = []
    for din, dout in LAYER_DIMS:
        key, wk, bk = jax.random.split(key, 3)
        bound = 1.0 / jnp.sqrt(jnp.float32(din))
        w = jax.random.uniform(wk, (dout, din), jnp.float32, -bound, bound)
        b = jax.random.uniform(bk, (dout,), jnp.float32, -bound, bound)
        params.append((w, b))
    return params


def reference_forward(x, params):
    h = x
    for i, (w, b) in enumerate(params):
        h = h @ w.T + b
        if i < len(params) - 1:
            h = jnp.maximum(h, 0.0)
    return h


if __name__ == "__main__":
    key = jax.random.PRNGKey(0)
    pkey, xkey = jax.random.split(key)
    params = init_params(pkey)

    # N not a multiple of the tile exercises the padding path; the adaptive
    # tile picks tb=512 -> 2 grid steps (both v7x TensorCores get work).
    N = 1000
    x = jax.random.normal(xkey, (N, 1), jnp.float32)
    ref = reference_forward(x, params)

    # f32 matmul path (exact to reference within f32 rounding).
    out = jax.block_until_ready(line_forward(x, params))
    assert out.shape == (N, 1)
    assert jnp.allclose(out, ref, atol=1e-5, rtol=1e-5)

    # bf16-operand matmul path (native MXU dtype on v6e/v7x), f32 accumulation;
    # relaxed tolerance per bf16 input rounding.
    out_bf16 = jax.block_until_ready(line_forward(x, params, use_bf16=True))
    assert jnp.allclose(out_bf16, ref, atol=5e-2, rtol=5e-2)

    print("KERNEL_OK")
</pallas_src>

<mosaic_0001>
module attributes {stable_mosaic.version = 11 : i64} {
  func.func @mlp_kernel(%arg0: i32, %arg1: memref<1x512xf32, #tpu.memory_space<vmem>>, %arg2: memref<20x1xf32, #tpu.memory_space<vmem>>, %arg3: memref<20x1xf32, #tpu.memory_space<vmem>>, %arg4: memref<64x20xf32, #tpu.memory_space<vmem>>, %arg5: memref<64x1xf32, #tpu.memory_space<vmem>>, %arg6: memref<128x64xf32, #tpu.memory_space<vmem>>, %arg7: memref<128x1xf32, #tpu.memory_space<vmem>>, %arg8: memref<64x128xf32, #tpu.memory_space<vmem>>, %arg9: memref<64x1xf32, #tpu.memory_space<vmem>>, %arg10: memref<1x64xf32, #tpu.memory_space<vmem>>, %arg11: memref<1x1xf32, #tpu.memory_space<vmem>>, %arg12: memref<1x512xf32, #tpu.memory_space<vmem>>) attributes {dimension_semantics = [#tpu.dimension_semantics<parallel>], iteration_bounds = array<i64: 2>, scalar_prefetch = 0 : i64, scratch_operands = 0 : i64, tpu.core_type = #tpu.core_type<tc>, window_params = [{transform_indices = @transform_0, window_bounds = array<i64: 1, 512>}, {pipeline_mode = #tpu.pipeline_mode<synchronous>, transform_indices = @transform_1, window_bounds = array<i64: 20, 1>}, {pipeline_mode = #tpu.pipeline_mode<synchronous>, transform_indices = @transform_2, window_bounds = array<i64: 20, 1>}, {pipeline_mode = #tpu.pipeline_mode<synchronous>, transform_indices = @transform_3, window_bounds = array<i64: 64, 20>}, {pipeline_mode = #tpu.pipeline_mode<synchronous>, transform_indices = @transform_4, window_bounds = array<i64: 64, 1>}, {pipeline_mode = #tpu.pipeline_mode<synchronous>, transform_indices = @transform_5, window_bounds = array<i64: 128, 64>}, {pipeline_mode = #tpu.pipeline_mode<synchronous>, transform_indices = @transform_6, window_bounds = array<i64: 128, 1>}, {pipeline_mode = #tpu.pipeline_mode<synchronous>, transform_indices = @transform_7, window_bounds = array<i64: 64, 128>}, {pipeline_mode = #tpu.pipeline_mode<synchronous>, transform_indices = @transform_8, window_bounds = array<i64: 64, 1>}, {pipeline_mode = #tpu.pipeline_mode<synchronous>, transform_indices = @transform_9, window_bounds = array<i64: 1, 64>}, {pipeline_mode = #tpu.pipeline_mode<synchronous>, transform_indices = @transform_10, window_bounds = array<i64: 1, 1>}, {transform_indices = @transform_11, window_bounds = array<i64: 1, 512>}]} {
    %c0 = arith.constant 0 : index
    %c0_0 = arith.constant 0 : index
    %0 = vector.load %arg2[%c0, %c0_0] : memref<20x1xf32, #tpu.memory_space<vmem>>, vector<20x1xf32>
    %c0_1 = arith.constant 0 : index
    %c0_2 = arith.constant 0 : index
    %1 = vector.load %arg3[%c0_1, %c0_2] : memref<20x1xf32, #tpu.memory_space<vmem>>, vector<20x1xf32>
    %c0_3 = arith.constant 0 : index
    %c0_4 = arith.constant 0 : index
    %2 = vector.load %arg4[%c0_3, %c0_4] : memref<64x20xf32, #tpu.memory_space<vmem>>, vector<64x20xf32>
    %c0_5 = arith.constant 0 : index
    %c0_6 = arith.constant 0 : index
    %3 = vector.load %arg5[%c0_5, %c0_6] : memref<64x1xf32, #tpu.memory_space<vmem>>, vector<64x1xf32>
    %c0_7 = arith.constant 0 : index
    %c0_8 = arith.constant 0 : index
    %4 = vector.load %arg6[%c0_7, %c0_8] : memref<128x64xf32, #tpu.memory_space<vmem>>, vector<128x64xf32>
    %c0_9 = arith.constant 0 : index
    %c0_10 = arith.constant 0 : index
    %5 = vector.load %arg7[%c0_9, %c0_10] : memref<128x1xf32, #tpu.memory_space<vmem>>, vector<128x1xf32>
    %c0_11 = arith.constant 0 : index
    %c0_12 = arith.constant 0 : index
    %6 = vector.load %arg8[%c0_11, %c0_12] : memref<64x128xf32, #tpu.memory_space<vmem>>, vector<64x128xf32>
    %c0_13 = arith.constant 0 : index
    %c0_14 = arith.constant 0 : index
    %7 = vector.load %arg9[%c0_13, %c0_14] : memref<64x1xf32, #tpu.memory_space<vmem>>, vector<64x1xf32>
    %c0_15 = arith.constant 0 : index
    %c0_16 = arith.constant 0 : index
    %8 = vector.load %arg10[%c0_15, %c0_16] : memref<1x64xf32, #tpu.memory_space<vmem>>, vector<1x64xf32>
    %c0_17 = arith.constant 0 : index
    %c0_18 = arith.constant 0 : index
    %9 = vector.load %arg11[%c0_17, %c0_18] : memref<1x1xf32, #tpu.memory_space<vmem>>, vector<1x1xf32>
    %c0_i32 = arith.constant 0 : i32
    %c256_i32 = arith.constant 256 : i32
    %10 = arith.muli %c0_i32, %c256_i32 : i32
    %11 = tpu.assume_multiple %10, 256 : i32
    %c0_19 = arith.constant 0 : index
    %12 = arith.index_cast %11 : i32 to index
    %13 = vector.load %arg1[%c0_19, %12] : memref<1x512xf32, #tpu.memory_space<vmem>>, vector<1x256xf32>
    %14 = vector.broadcast %0 : vector<20x1xf32> to vector<20x256xf32>
    %15 = vector.broadcast %13 : vector<1x256xf32> to vector<20x256xf32>
    %16 = arith.mulf %14, %15 : vector<20x256xf32>
    %17 = vector.broadcast %1 : vector<20x1xf32> to vector<20x256xf32>
    %18 = arith.addf %16, %17 : vector<20x256xf32>
    %cst = arith.constant 0.000000e+00 : f32
    %19 = vector.broadcast %cst : f32 to vector<20x256xf32>
    %20 = arith.maximumf %18, %19 : vector<20x256xf32>
    %cst_20 = arith.constant dense<0.000000e+00> : vector<64x256xf32>
    %21 = tpu.matmul %2, %20, %cst_20 {dimension_numbers = #tpu.dot_dimension_numbers<[1], [0], [0], [1], [0, 0, 1, 1], [], []>} : vector<64x20xf32>, vector<20x256xf32>, vector<64x256xf32> -> vector<64x256xf32>
    %22 = vector.broadcast %3 : vector<64x1xf32> to vector<64x256xf32>
    %23 = arith.addf %21, %22 : vector<64x256xf32>
    %cst_21 = arith.constant 0.000000e+00 : f32
    %24 = vector.broadcast %cst_21 : f32 to vector<64x256xf32>
    %25 = arith.maximumf %23, %24 : vector<64x256xf32>
    %cst_22 = arith.constant dense<0.000000e+00> : vector<128x256xf32>
    %26 = tpu.matmul %4, %25, %cst_22 {dimension_numbers = #tpu.dot_dimension_numbers<[1], [0], [0], [1], [0, 0, 1, 1], [], []>} : vector<128x64xf32>, vector<64x256xf32>, vector<128x256xf32> -> vector<128x256xf32>
    %27 = vector.broadcast %5 : vector<128x1xf32> to vector<128x256xf32>
    %28 = arith.addf %26, %27 : vector<128x256xf32>
    %cst_23 = arith.constant 0.000000e+00 : f32
    %29 = vector.broadcast %cst_23 : f32 to vector<128x256xf32>
    %30 = arith.maximumf %28, %29 : vector<128x256xf32>
    %cst_24 = arith.constant dense<0.000000e+00> : vector<64x256xf32>
    %31 = tpu.matmul %6, %30, %cst_24 {dimension_numbers = #tpu.dot_dimension_numbers<[1], [0], [0], [1], [0, 0, 1, 1], [], []>} : vector<64x128xf32>, vector<128x256xf32>, vector<64x256xf32> -> vector<64x256xf32>
    %32 = vector.broadcast %7 : vector<64x1xf32> to vector<64x256xf32>
    %33 = arith.addf %31, %32 : vector<64x256xf32>
    %cst_25 = arith.constant 0.000000e+00 : f32
    %34 = vector.broadcast %cst_25 : f32 to vector<64x256xf32>
    %35 = arith.maximumf %33, %34 : vector<64x256xf32>
    %cst_26 = arith.constant dense<0.000000e+00> : vector<1x256xf32>
    %36 = tpu.matmul %8, %35, %cst_26 {dimension_numbers = #tpu.dot_dimension_numbers<[1], [0], [0], [1], [0, 0, 1, 1], [], []>} : vector<1x64xf32>, vector<64x256xf32>, vector<1x256xf32> -> vector<1x256xf32>
    %37 = vector.broadcast %9 : vector<1x1xf32> to vector<1x256xf32>
    %38 = arith.addf %36, %37 : vector<1x256xf32>
    %c0_27 = arith.constant 0 : index
    %39 = arith.index_cast %11 : i32 to index
    %40 = vector.load %arg12[%c0_27, %39] : memref<1x512xf32, #tpu.memory_space<vmem>>, vector<1x256xf32>
    tpu.vector_store %arg12[%c0_27, %39], %38 {strides = array<i32>} : memref<1x512xf32, #tpu.memory_space<vmem>>, vector<1x256xf32>,
    %c1_i32 = arith.constant 1 : i32
    %c256_i32_28 = arith.constant 256 : i32
    %41 = arith.muli %c1_i32, %c256_i32_28 : i32
    %42 = tpu.assume_multiple %41, 256 : i32
    %c0_29 = arith.constant 0 : index
    %43 = arith.index_cast %42 : i32 to index
    %44 = vector.load %arg1[%c0_29, %43] : memref<1x512xf32, #tpu.memory_space<vmem>>, vector<1x256xf32>
    %45 = vector.broadcast %0 : vector<20x1xf32> to vector<20x256xf32>
    %46 = vector.broadcast %44 : vector<1x256xf32> to vector<20x256xf32>
    %47 = arith.mulf %45, %46 : vector<20x256xf32>
    %48 = vector.broadcast %1 : vector<20x1xf32> to vector<20x256xf32>
    %49 = arith.addf %47, %48 : vector<20x256xf32>
    %cst_30 = arith.constant 0.000000e+00 : f32
    %50 = vector.broadcast %cst_30 : f32 to vector<20x256xf32>
    %51 = arith.maximumf %49, %50 : vector<20x256xf32>
    %cst_31 = arith.constant dense<0.000000e+00> : vector<64x256xf32>
    %52 = tpu.matmul %2, %51, %cst_31 {dimension_numbers = #tpu.dot_dimension_numbers<[1], [0], [0], [1], [0, 0, 1, 1], [], []>} : vector<64x20xf32>, vector<20x256xf32>, vector<64x256xf32> -> vector<64x256xf32>
    %53 = vector.broadcast %3 : vector<64x1xf32> to vector<64x256xf32>
    %54 = arith.addf %52, %53 : vector<64x256xf32>
    %cst_32 = arith.constant 0.000000e+00 : f32
    %55 = vector.broadcast %cst_32 : f32 to vector<64x256xf32>
    %56 = arith.maximumf %54, %55 : vector<64x256xf32>
    %cst_33 = arith.constant dense<0.000000e+00> : vector<128x256xf32>
    %57 = tpu.matmul %4, %56, %cst_33 {dimension_numbers = #tpu.dot_dimension_numbers<[1], [0], [0], [1], [0, 0, 1, 1], [], []>} : vector<128x64xf32>, vector<64x256xf32>, vector<128x256xf32> -> vector<128x256xf32>
    %58 = vector.broadcast %5 : vector<128x1xf32> to vector<128x256xf32>
    %59 = arith.addf %57, %58 : vector<128x256xf32>
    %cst_34 = arith.constant 0.000000e+00 : f32
    %60 = vector.broadcast %cst_34 : f32 to vector<128x256xf32>
    %61 = arith.maximumf %59, %60 : vector<128x256xf32>
    %cst_35 = arith.constant dense<0.000000e+00> : vector<64x256xf32>
    %62 = tpu.matmul %6, %61, %cst_35 {dimension_numbers = #tpu.dot_dimension_numbers<[1], [0], [0], [1], [0, 0, 1, 1], [], []>} : vector<64x128xf32>, vector<128x256xf32>, vector<64x256xf32> -> vector<64x256xf32>
    %63 = vector.broadcast %7 : vector<64x1xf32> to vector<64x256xf32>
    %64 = arith.addf %62, %63 : vector<64x256xf32>
    %cst_36 = arith.constant 0.000000e+00 : f32
    %65 = vector.broadcast %cst_36 : f32 to vector<64x256xf32>
    %66 = arith.maximumf %64, %65 : vector<64x256xf32>
    %cst_37 = arith.constant dense<0.000000e+00> : vector<1x256xf32>
    %67 = tpu.matmul %8, %66, %cst_37 {dimension_numbers = #tpu.dot_dimension_numbers<[1], [0], [0], [1], [0, 0, 1, 1], [], []>} : vector<1x64xf32>, vector<64x256xf32>, vector<1x256xf32> -> vector<1x256xf32>
    %68 = vector.broadcast %9 : vector<1x1xf32> to vector<1x256xf32>
    %69 = arith.addf %67, %68 : vector<1x256xf32>
    %c0_38 = arith.constant 0 : index
    %70 = arith.index_cast %42 : i32 to index
    %71 = vector.load %arg12[%c0_38, %70] : memref<1x512xf32, #tpu.memory_space<vmem>>, vector<1x256xf32>
    tpu.vector_store %arg12[%c0_38, %70], %69 {strides = array<i32>} : memref<1x512xf32, #tpu.memory_space<vmem>>, vector<1x256xf32>,
    %c2_i32 = arith.constant 2 : i32
    return
  }
  func.func @transform_0(%arg0: i32) -> (i32, i32) {
    %c0_i32 = arith.constant 0 : i32
    %c0_i32_0 = arith.constant 0 : i32
    return %c0_i32, %arg0 : i32, i32
  }
  func.func @transform_1(%arg0: i32) -> (i32, i32) {
    %c0_i32 = arith.constant 0 : i32
    %c0_i32_0 = arith.constant 0 : i32
    %c0_i32_1 = arith.constant 0 : i32
    return %c0_i32, %c0_i32_0 : i32, i32
  }
  func.func @transform_2(%arg0: i32) -> (i32, i32) {
    %c0_i32 = arith.constant 0 : i32
    %c0_i32_0 = arith.constant 0 : i32
    %c0_i32_1 = arith.constant 0 : i32
    return %c0_i32, %c0_i32_0 : i32, i32
  }
  func.func @transform_3(%arg0: i32) -> (i32, i32) {
    %c0_i32 = arith.constant 0 : i32
    %c0_i32_0 = arith.constant 0 : i32
    %c0_i32_1 = arith.constant 0 : i32
    return %c0_i32, %c0_i32_0 : i32, i32
  }
  func.func @transform_4(%arg0: i32) -> (i32, i32) {
    %c0_i32 = arith.constant 0 : i32
    %c0_i32_0 = arith.constant 0 : i32
    %c0_i32_1 = arith.constant 0 : i32
    return %c0_i32, %c0_i32_0 : i32, i32
  }
  func.func @transform_5(%arg0: i32) -> (i32, i32) {
    %c0_i32 = arith.constant 0 : i32
    %c0_i32_0 = arith.constant 0 : i32
    %c0_i32_1 = arith.constant 0 : i32
    return %c0_i32, %c0_i32_0 : i32, i32
  }
  func.func @transform_6(%arg0: i32) -> (i32, i32) {
    %c0_i32 = arith.constant 0 : i32
    %c0_i32_0 = arith.constant 0 : i32
    %c0_i32_1 = arith.constant 0 : i32
    return %c0_i32, %c0_i32_0 : i32, i32
  }
  func.func @transform_7(%arg0: i32) -> (i32, i32) {
    %c0_i32 = arith.constant 0 : i32
    %c0_i32_0 = arith.constant 0 : i32
    %c0_i32_1 = arith.constant 0 : i32
    return %c0_i32, %c0_i32_0 : i32, i32
  }
  func.func @transform_8(%arg0: i32) -> (i32, i32) {
    %c0_i32 = arith.constant 0 : i32
    %c0_i32_0 = arith.constant 0 : i32
    %c0_i32_1 = arith.constant 0 : i32
    return %c0_i32, %c0_i32_0 : i32, i32
  }
  func.func @transform_9(%arg0: i32) -> (i32, i32) {
    %c0_i32 = arith.constant 0 : i32
    %c0_i32_0 = arith.constant 0 : i32
    %c0_i32_1 = arith.constant 0 : i32
    return %c0_i32, %c0_i32_0 : i32, i32
  }
  func.func @transform_10(%arg0: i32) -> (i32, i32) {
    %c0_i32 = arith.constant 0 : i32
    %c0_i32_0 = arith.constant 0 : i32
    %c0_i32_1 = arith.constant 0 : i32
    return %c0_i32, %c0_i32_0 : i32, i32
  }
  func.func @transform_11(%arg0: i32) -> (i32, i32) {
    %c0_i32 = arith.constant 0 : i32
    %c0_i32_0 = arith.constant 0 : i32
    return %c0_i32, %arg0 : i32, i32
  }
}

</mosaic_0001>

<bundles_post_ra>
// kernel: tpu_custom_call.1
= control target key start
LH: loop header
LB: loop body
LE: loop exit
PB: predicated region body
PF: predicated region fallthrough
CT: control target
= control target key end

     0   :  { %s3172_s0 = inlined_call_operand.vmem [shape: f32[1,1024], index: 0, kind: input, shape index: {}]   ;;  %s3173_s1 = inlined_call_operand.vmem [shape: f32[20,1], index: 1, kind: input, shape index: {}]   ;;  %s3174_s2 = inlined_call_operand.vmem [shape: f32[20,1], index: 2, kind: input, shape index: {}]   ;;  %s3175_s3 = inlined_call_operand.vmem [shape: f32[64,20], index: 3, kind: input, shape index: {}]   ;;  %s3176_s4 = inlined_call_operand.vmem [shape: f32[64,1], index: 4, kind: input, shape index: {}]   ;;  %s3177_s5 = inlined_call_operand.vmem [shape: f32[128,64], index: 5, kind: input, shape index: {}]   ;;  %s3178_s6 = inlined_call_operand.vmem [shape: f32[128,1], index: 6, kind: input, shape index: {}]   ;;  %s3179_s7 = inlined_call_operand.vmem [shape: f32[64,128], index: 7, kind: input, shape index: {}]   ;;  %s3180_s8 = inlined_call_operand.vmem [shape: f32[64,1], index: 8, kind: input, shape index: {}]   ;;  %s3181_s9 = inlined_call_operand.vmem [shape: f32[1,64], index: 9, kind: input, shape index: {}]   ;;  %s3182_s10 = inlined_call_operand.<no memory space> [shape: f32[1,1], index: 10, kind: input, shape index: {}]   ;;  %s3183_s11 = inlined_call_operand.hbm [shape: f32[1,1024], index: 11, kind: output, shape index: {}]  }
   0x1   :  { %v16_v0 = vstv %s3182_s10 }
   0x2   :  { %17 = vst [vmem:[#allocation2] sm:$0x1] %v16_v0 }
   0x3   :  { %18 = vsyncpa [#allocation4], 0 }
   0x4   :  { %20 = vsyncpa [#allocation4 + $0x1], 0  ;;  %s2346_s19 = smov 0   ;;  %s2348_s20 = smov 0  }
   0x5   :  { %s2350_s21 = smov 0   ;;  %s2352_s22 = smov 0  }
   0x6 LB: > { %s2367_s10 = sadd.s32 4294967295, %s2277_s22   ;;  %s1967_s23 = sadd.s32 4294967294, %s2277_s22   ;;  %s2277_s22 = sphi %s2352_s22, %s3284_s22   ;;  %s2273_s21 = sphi %s2350_s21, %s3283_s21   ;;  %s2269_s20 = sphi %s2348_s20, %s3282_s20   ;;  %s2265_s19 = sphi %s2346_s19, %s3281_s19  }
   0x7   : > { %s2371_s24 = sadd.s32 1, %s2277_s22   ;;  %s269_s25 = sadd.s32 1, %s2273_s21 }
   0x8   : > { %s266_s26 = ssub.s32 %s2277_s22, %s2371_s24  ;;  %p279_p0 = scmp.ne.s32.totalorder %s2273_s21, %s2269_s20 }
   0x9   : > { %p267_p1 = scmp.eq.s32.totalorder %s266_s26, 0  ;;  %p280_p2 = scmp.eq.s32.totalorder %s2367_s10, 1 }
   0xa   : > { %p285_p3 = scmp.ne.s32.totalorder %s2269_s20, %s2265_s19  ;;  %p286_p4 = scmp.eq.s32.totalorder %s1967_s23, 1 }
   0xb   : > { %s2382_s27 = scalar_select %p267_p1, %s2273_s21, %s269_s25  }
   0xc   : > { %p2384_p5 = por %p280_p2, %p279_p0  ;;  %p2388_p6 = por %p286_p4, %p285_p3 }
   0xd   : > { %p1970_p7 = scmp.ge.s32.totalorder %s2277_s22, 1  ;;  %p342_p8 = scmp.lt.s32.totalorder %s2277_s22, 3 }
   0xf   : > { %p343_p9 = pnand %p1970_p7, %p342_p8 }
  0x11   : > { %346 = sbr.rel (%p343_p9) target bundleno = 1984 (0x7c0), region = 64 }
  0x18   : > { %v390_v1 = vld [vmem:[%s3174_s2] sm:$0xff]  ;;  %s1972_s15 = sshll.u32 %s2367_s10, 2  ;;  %v2279_v3 = vmov 0   ;;  %v3184_v4 = vlaneseq  ;;  %v391_v5 = vld [vmem:[%s3174_s2 + $0x8] sm:$0xff]  ;;  %v392_v8 = vld [vmem:[%s3174_s2 + $0x10] sm:$0xf] }
  0x19   : > { %v387_v2 = vld [vmem:[%s3173_s1] sm:$0xff]  ;;  %2214 = vset.pattern.permute.xlu1 %v2279_v3  ;;  %2213 = vset.pattern.permute.xlu0 %v2279_v3  ;;  %p382_p10 = scmp.lt.s32.totalorder %s1972_s15, 7  ;;  %v388_v6 = vld [vmem:[%s3173_s1 + $0x8] sm:$0xff]  ;;  %v389_v9 = vld [vmem:[%s3173_s1 + $0x10] sm:$0xf]  ;;  %v3185_v19 = vmov 0.0  }
  0x1a   : > { %494 = vperm.xlu1 %2214, %v390_v1   ;;  %462 = vperm.xlu0 %2213, %v387_v2   ;;  %v2408_v7 = vshrl.u32 %v3184_v4, 7  ;;  %v402_v11 = vld [vmem:[%s3176_s4 + $0x8] sm:$0xff]  ;;  %v401_v12 = vld [vmem:[%s3176_s4] sm:$0xff]  ;;  %v404_v15 = vld [vmem:[%s3176_s4 + $0x18] sm:$0xff]  ;;  %vm584_vm0 = vcmask 1043456   ;;  %vm559_vm1 = vcmask 162816  }
  0x1b   : > { %s3286_s15 = smov (!%p382_p10, %s1972_s15), 7  ;;  %v403_v16 = vld [vmem:[%s3176_s4 + $0x10] sm:$0xff]  ;;  %v406_v17 = vld [vmem:[%s3176_s4 + $0x28] sm:$0xff]  ;;  %v405_v18 = vld [vmem:[%s3176_s4 + $0x20] sm:$0xff]  ;;  %655 = vmatprep.mubr.f32.mxu0 %v3185_v19  ;;  %913 = vmatprep.mubr.f32.mxu1 %v3185_v19  ;;  %vm800_vm2 = vcmask 523264   ;;  %s2034_s30 = sshll.u32 %s2367_s10, 6 }
  0x1c   : > { %v482_v10 = vsub.s32 1, %v2408_v7  ;;  %s2420_s16 = scalar_lea.vmem %s3172_s0, %s3286_s15  ;;  %v408_v20 = vld [vmem:[%s3176_s4 + $0x38] sm:$0xff]  ;;  %v407_v21 = vld [vmem:[%s3176_s4 + $0x30] sm:$0xff]  ;;  %v426_v22 = vld [vmem:[%s3178_s6 + $0x8] sm:$0xff]  ;;  %v2529_v47 = vsub.s32 0, %v2408_v7  ;;  %s3125_s17 = scalar_lea.hbm %s3183_s11, %s2034_s30 }
  0x1d   : > { %v2429_v13 = vld [vmem:[%s2420_s16 + $0x2] sm:$0x3]  ;;  %v428_v24 = vld [vmem:[%s3178_s6 + $0x18] sm:$0xff]  ;;  %v427_v25 = vld [vmem:[%s3178_s6 + $0x10] sm:$0xff]  ;;  %s2282_s23 = smov [#allocation3]  }
  0x1e   : > { %499 = vperm.xlu1 %2214, %v391_v5   ;;  %467 = vperm.xlu0 %2213, %v388_v6   ;;  %v2434_v14 = vrot.slane %v2429_v13, %v482_v10  ;;  %v425_v23 = vld [vmem:[%s3178_s6] sm:$0xff]  ;;  %v430_v26 = vld [vmem:[%s3178_s6 + $0x28] sm:$0xff]  ;;  %v432_v28 = vld [vmem:[%s3178_s6 + $0x38] sm:$0xff]  ;;  %v1323_v50 = vrot.slane %v2429_v13, %v2529_v47  ;;  %s2219_s25 = sshll.u32 %s2282_s23, 4  ;;  %s2220_s25 = int_to_ptr.vmem [resolvable:$false] %s2219_s25 }
  0x1f   : > { %v429_v27 = vld [vmem:[%s3178_s6 + $0x20] sm:$0xff]  ;;  %v431_v29 = vld [vmem:[%s3178_s6 + $0x30] sm:$0xff]  ;;  %v434_v30 = vld [vmem:[%s3178_s6 + $0x48] sm:$0xff] }
  0x20   : > { %v433_v31 = vld [vmem:[%s3178_s6 + $0x40] sm:$0xff]  ;;  %v436_v32 = vld [vmem:[%s3178_s6 + $0x58] sm:$0xff]  ;;  %v435_v33 = vld [vmem:[%s3178_s6 + $0x50] sm:$0xff] }
  0x21   : > { %v438_v34 = vld [vmem:[%s3178_s6 + $0x68] sm:$0xff]  ;;  %v437_v35 = vld [vmem:[%s3178_s6 + $0x60] sm:$0xff]  ;;  %v440_v36 = vld [vmem:[%s3178_s6 + $0x78] sm:$0xff] }
  0x22   : > { %504 = vperm.xlu1 %2214, %v392_v8   ;;  %472 = vperm.xlu0 %2213, %v389_v9   ;;  %v439_v37 = vld [vmem:[%s3178_s6 + $0x70] sm:$0xff]  ;;  %v450_v38 = vld [vmem:[%s3180_s8 + $0x8] sm:$0xff]  ;;  %v449_v39 = vld [vmem:[%s3180_s8] sm:$0xff] }
  0x23   : > { %v452_v40 = vld [vmem:[%s3180_s8 + $0x18] sm:$0xff]  ;;  %v451_v41 = vld [vmem:[%s3180_s8 + $0x10] sm:$0xff]  ;;  %v454_v42 = vld [vmem:[%s3180_s8 + $0x28] sm:$0xff] }
  0x24   : > { %v453_v43 = vld [vmem:[%s3180_s8 + $0x20] sm:$0xff]  ;;  %v456_v44 = vld [vmem:[%s3180_s8 + $0x38] sm:$0xff]  ;;  %v455_v45 = vld [vmem:[%s3180_s8 + $0x30] sm:$0xff] }
  0x25   : > { %v458_v46 = vld [vmem:[#allocation2] sm:$0x1] }
  0x26   : > { %526 = vperm.xlu1 %2214, %v402_v11   ;;  %521 = vperm.xlu0 %2213, %v401_v12   ;;  %v459_v48 = vld [vmem:[%s2420_s16] sm:$0x3]  ;;  %s378_s16 = sand.u32 1, %s2269_s20  }
  0x27   : > { %v479_v49 = vrot.slane %v459_v48, %v2529_v47  ;;  %v483_v51 = vrot.slane %v459_v48, %v482_v10  ;;  %s1971_s15 = sshll.u32 %s378_s16, 2  ;;  %s1897_s10 = scalar_lea.sflag [#allocation4], %s378_s16 }
  0x28   : > { %s2984_s26 = scalar_lea.vmem [#allocation3], %s1971_s15  ;;  %s2221_s15 = scalar_lea.vmem %s2220_s25, 128 }
  0x29   : > { %s1911_s12 = sshll.u32 %s2984_s26, 4  ;;  %s3127_s12 = int_to_ptr.vmem [resolvable:$true] %s1911_s12 }
  0x2a   : > { %536 = vperm.xlu1 %2214, %v404_v15   ;;  %531 = vperm.xlu0 %2213, %v403_v16   ;;  %s2215_s18 = scalar_lea.vmem %s3127_s12, 64  ;;  %p2222_p0 = scmp.lt.s32.totalorder %s3127_s12, %s2220_s25 }
  0x2b   : > { %p2216_p11 = scmp.ne.s32.totalorder %s3127_s12, %s2215_s18  ;;  %p2223_p1 = scmp.lt.s32.totalorder %s2221_s15, %s2215_s18 }
  0x2d   : > { %p2217_p12 = pnand %p2216_p11, %p2384_p5  ;;  %p2224_p2 = por %p2223_p1, %p2222_p0 }
  0x2e   : > { %546 = vperm.xlu1 %2214, %v406_v17   ;;  %541 = vperm.xlu0 %2213, %v405_v18  }
  0x2f   : > { %p2218_p13 = pneg %p2217_p12 }
  0x31   : > { %p2225_p3 = pnand %p2224_p2, %p2218_p13 }
  0x32   : > { %556 = vperm.xlu1 %2214, %v408_v20   ;;  %551 = vperm.xlu0 %2213, %v407_v21  }
  0x36   : > { %727 = vperm.xlu1 %2214, %v426_v22   ;;  %722 = vperm.xlu0 %2213, %v425_v23  }
  0x3a   : > { %737 = vperm.xlu1 %2214, %v428_v24   ;;  %732 = vperm.xlu0 %2213, %v427_v25  }
  0x3e   : > { %747 = vperm.xlu1 %2214, %v430_v26   ;;  %742 = vperm.xlu0 %2213, %v429_v27  }
  0x42   : > { %757 = vperm.xlu1 %2214, %v432_v28   ;;  %752 = vperm.xlu0 %2213, %v431_v29  }
  0x46   : > { %767 = vperm.xlu1 %2214, %v434_v30   ;;  %762 = vperm.xlu0 %2213, %v433_v31  }
  0x4a   : > { %777 = vperm.xlu1 %2214, %v436_v32   ;;  %772 = vperm.xlu0 %2213, %v435_v33  }
  0x4e   : > { %787 = vperm.xlu1 %2214, %v438_v34   ;;  %782 = vperm.xlu0 %2213, %v437_v35   ;;  %v2552_v35 = vld [vmem:[%s3175_s3] sm:$0xff] }
  0x52   : > { %797 = vperm.xlu1 %2214, %v440_v36   ;;  %792 = vperm.xlu0 %2213, %v439_v37   ;;  %v2561_v36 = vld [vmem:[%s3175_s3 + $0x8] sm:$0xff]  ;;  %v2569_v37 = vld [vmem:[%s3175_s3 + $0x10] sm:$0xff] }
  0x56   : > { %1049 = vperm.xlu1 %2214, %v450_v38   ;;  %1044 = vperm.xlu0 %2213, %v449_v39   ;;  %v2577_v38 = vld [vmem:[%s3175_s3 + $0x18] sm:$0xff]  ;;  %v2585_v39 = vld [vmem:[%s3175_s3 + $0x20] sm:$0xff] }
  0x5a   : > { %1059 = vperm.xlu1 %2214, %v452_v40   ;;  %1054 = vperm.xlu0 %2213, %v451_v41   ;;  %v2593_v40 = vld [vmem:[%s3175_s3 + $0x28] sm:$0xff]  ;;  %v2601_v41 = vld [vmem:[%s3175_s3 + $0x30] sm:$0xff] }
  0x5e   : > { %1069 = vperm.xlu1 %2214, %v454_v42   ;;  %1064 = vperm.xlu0 %2213, %v453_v43   ;;  %v2609_v42 = vld [vmem:[%s3175_s3 + $0x38] sm:$0xff] }
  0x62   : > { %1079 = vperm.xlu1 %2214, %v456_v44   ;;  %1074 = vperm.xlu0 %2213, %v455_v45  }
  0x66   : > { %1213 = vperm.xlu0 %2213, %v458_v46  }
  0x99   : > { %v495_v52 = vpop.permute.xlu1 %494  ;;  %v463_v53 = vpop.permute.xlu0 %462 }
  0x9a   : > { %v486_v54 = vmul.f32 %v479_v49, %v463_v53  ;;  %v1330_v55 = vmul.f32 %v1323_v50, %v463_v53  ;;  %v1331_v56 = vmul.f32 %v2434_v14, %v463_v53  ;;  %v487_v57 = vmul.f32 %v483_v51, %v463_v53 }
  0x9c   : > { %v1336_v58 = vadd.f32 %v1330_v55, %v495_v52  ;;  %v1337_v59 = vadd.f32 %v1331_v56, %v495_v52  ;;  %v508_v62 = vadd.f32 %v495_v52, %v487_v57  ;;  %v507_v63 = vadd.f32 %v495_v52, %v486_v54 }
  0x9d   : > { %v500_v60 = vpop.permute.xlu1 %499  ;;  %v468_v61 = vpop.permute.xlu0 %467 }
  0x9e   : > { %v488_v0 = vmul.f32 %v479_v49, %v468_v61  ;;  %v1332_v1 = vmul.f32 %v1323_v50, %v468_v61  ;;  %v1333_v2 = vmul.f32 %v2434_v14, %v468_v61  ;;  %v489_v3 = vmul.f32 %v483_v51, %v468_v61 }
  0x9f   : > { %v1342_v5 = vmax.f32 %v1336_v58, 0.0  ;;  %v514_v12 = vmax.f32 %v508_v62, 0.0  ;;  %v513_v13 = vmax.f32 %v507_v63, 0.0  ;;  %v1343_v15 = vmax.f32 %v1337_v59, 0.0 }
  0xa0   : > { %v1338_v6 = vadd.f32 %v1332_v1, %v500_v60  ;;  %v509_v8 = vadd.f32 %v500_v60, %v488_v0  ;;  %v1339_v9 = vadd.f32 %v1333_v2, %v500_v60  ;;  %v510_v11 = vadd.f32 %v500_v60, %v489_v3 }
  0xa1   : > { %v473_v10 = vpop.permute.xlu0 %472  ;;  %v505_v21 = vpop.permute.xlu1 %504 }
  0xa2   : > { %v1344_v16 = vmax.f32 %v1338_v6, 0.0  ;;  %v490_v17 = vmul.f32 %v479_v49, %v473_v10  ;;  %v491_v18 = vmul.f32 %v483_v51, %v473_v10  ;;  %v1334_v20 = vmul.f32 %v1323_v50, %v473_v10 }
  0xa3   : > { %v1335_v22 = vmul.f32 %v2434_v14, %v473_v10  ;;  %v516_v23 = vmax.f32 %v510_v11, 0.0  ;;  %v515_v24 = vmax.f32 %v509_v8, 0.0  ;;  %v1345_v25 = vmax.f32 %v1339_v9, 0.0 }
  0xa4   : > { %v512_v26 = vadd.f32 %v505_v21, %v491_v18  ;;  %v2540_v27 = vadd.f32 %v1334_v20, %v505_v21  ;;  %v2542_v28 = vpack.c.bf16 %v1344_v16, %v1342_v5  ;;  %v511_v33 = vadd.f32 %v505_v21, %v490_v17 }
  0xa5   : > { %v2544_v29 = vadd.f32 %v1335_v22, %v505_v21  ;;  %v2035_v30 = vpack.c.bf16 %v516_v23, %v514_v12  ;;  %v2037_v31 = vpack.c.bf16 %v515_v24, %v513_v13  ;;  %v2546_v32 = vpack.c.bf16 %v1345_v25, %v1343_v15  ;;  %v2614_v45 = vpop.permute.xlu0 %521  ;;  %v2617_v48 = vpop.permute.xlu1 %526 }
  0xa6   : > { %v518_v34 = vmax.f32 %v512_v26, 0.0  ;;  %v517_v14 = vmax.f32 %v511_v33, 0.0 }
  0xa7   : > { %2036 = vmatprep.subr.bf16.mxu0 %v2035_v30 }
  0xa8   : > { %2038 = vmatpush1.bf16.msra.mxu0 %v2037_v31 }
  0xa9   : > { %1973 = vmatprep.subr.msk.mxu0 %vm584_vm0, %v518_v34  ;;  %v2622_v61 = vpop.permute.xlu0 %531  ;;  %v2625_v0 = vpop.permute.xlu1 %536 }
  0xac   : > { %1974 = vmatpush1.msk.msra.mxu0 %vm584_vm0, %v517_v14 }
  0xad   : > { %1975 = vmatmul.mubr.msk.f32.vlgmr.msra.gmra.mrb[0].mxu0 %vm559_vm1, %v2552_v35  ;;  %v2630_v16 = vpop.permute.xlu0 %541  ;;  %v2633_v20 = vpop.permute.xlu1 %546 }
  0xae   : > { %661 = vmatprep.mubr.f32.mxu0 %v3185_v19 }
  0xb1   : > { %1976 = vmatmul.mubr.msk.f32.gmra.mrb[2].mxu0 %vm559_vm1, %v2561_v36 }
  0xb2   : > { %667 = vmatprep.mubr.f32.mxu0 %v3185_v19 }
  0xb5   : > { %1977 = vmatmul.mubr.msk.f32.gmra.mrb[4].mxu0 %vm559_vm1, %v2569_v37 }
  0xb6   : > { %673 = vmatprep.mubr.f32.mxu0 %v3185_v19 }
  0xb9   : > { %1978 = vmatmul.mubr.msk.f32.gmra.mrb[6].mxu0 %vm559_vm1, %v2577_v38 }
  0xba   : > { %679 = vmatprep.mubr.f32.mxu0 %v3185_v19 }
  0xbd   : > { %1979 = vmatmul.mubr.msk.f32.gmra.mrb[8].mxu0 %vm559_vm1, %v2585_v39 }
  0xbe   : > { %685 = vmatprep.mubr.f32.mxu0 %v3185_v19 }
  0xc1   : > { %1980 = vmatmul.mubr.msk.f32.gmra.mrb[10].mxu0 %vm559_vm1, %v2593_v40 }
  0xc2   : > { %691 = vmatprep.mubr.f32.mxu0 %v3185_v19 }
  0xc5   : > { %1981 = vmatmul.mubr.msk.f32.gmra.mrb[12].mxu0 %vm559_vm1, %v2601_v41 }
  0xc6   : > { %697 = vmatprep.mubr.f32.mxu0 %v3185_v19 }
  0xc9   : > { %1982 = vmatmul.mubr.msk.f32.gmra.mrb[14].mxu0 %vm559_vm1, %v2609_v42 }
  0xca   : > { %1146 = vmatprep.mubr.f32.mxu0 %v3185_v19 }
 0x180   : > { %v657_v43 = vpop.f32.mrb[0].mxu0 }
 0x181   : > { %v659_v44 = vpop.f32.mrb[1].mxu0  ;;  %v658_v46 = vadd.f32 %v657_v43, %v2614_v45 }
 0x182   : > { %v660_v49 = vadd.f32 %v659_v44, %v2614_v45  ;;  %v2638_v44 = vpop.permute.xlu0 %551 }
 0x183   : > { %v704_v54 = vmax.f32 %v658_v46, 0.0 }
 0x184   : > { %v663_v50 = vpop.f32.mrb[2].mxu0  ;;  %v705_v56 = vmax.f32 %v660_v49, 0.0 }
 0x185   : > { %v664_v51 = vadd.f32 %v663_v50, %v2617_v48  ;;  %v665_v52 = vpop.f32.mrb[3].mxu0  ;;  %v2641_v50 = vpop.permute.xlu1 %556 }
 0x186   : > { %v666_v53 = vadd.f32 %v665_v52, %v2617_v48 }
 0x187   : > { %v706_v55 = vmax.f32 %v664_v51, 0.0 }
 0x188   : > { %v707_v57 = vmax.f32 %v666_v53, 0.0  ;;  %v669_v58 = vpop.f32.mrb[4].mxu0 }
 0x189   : > { %v671_v59 = vpop.f32.mrb[5].mxu0  ;;  %v2041_v60 = vpack.c.bf16 %v706_v55, %v704_v54  ;;  %v670_v63 = vadd.f32 %v669_v58, %v2622_v61 }
 0x18a   : > { %v2039_v62 = vpack.c.bf16 %v707_v57, %v705_v56  ;;  %v672_v1 = vadd.f32 %v671_v59, %v2622_v61 }
 0x18b   : > { %v708_v8 = vmax.f32 %v670_v63, 0.0  ;;  %v2649_v63 = vld [vmem:[%s3177_s5] sm:$0xff] }
 0x18c   : > { %v675_v2 = vpop.f32.mrb[6].mxu0  ;;  %2040 = vmatprep.subr.bf16.mxu1 %v2039_v62  ;;  %v709_v10 = vmax.f32 %v672_v1, 0.0  ;;  %v2657_v1 = vld [vmem:[%s3177_s5 + $0x8] sm:$0xff] }
 0x18d   : > { %v676_v3 = vadd.f32 %v675_v2, %v2625_v0  ;;  %v677_v5 = vpop.f32.mrb[7].mxu0  ;;  %2042 = vmatpush1.bf16.msra.mxu1 %v2041_v60  ;;  %v2665_v2 = vld [vmem:[%s3177_s5 + $0x10] sm:$0xff] }
 0x18e   : > { %v678_v6 = vadd.f32 %v677_v5, %v2625_v0  ;;  %v2681_v5 = vld [vmem:[%s3177_s5 + $0x20] sm:$0xff] }
 0x18f   : > { %v710_v9 = vmax.f32 %v676_v3, 0.0  ;;  %v2673_v3 = vld [vmem:[%s3177_s5 + $0x18] sm:$0xff] }
 0x190   : > { %v711_v11 = vmax.f32 %v678_v6, 0.0  ;;  %v681_v12 = vpop.f32.mrb[8].mxu0  ;;  %v2689_v6 = vld [vmem:[%s3177_s5 + $0x28] sm:$0xff] }
 0x191   : > { %v2045_v13 = vpack.c.bf16 %v710_v9, %v708_v8  ;;  %v683_v15 = vpop.f32.mrb[9].mxu0  ;;  %v682_v18 = vadd.f32 %v681_v12, %v2630_v16  ;;  %v2697_v8 = vld [vmem:[%s3177_s5 + $0x30] sm:$0xff]  ;;  %v2705_v9 = vld [vmem:[%s3177_s5 + $0x38] sm:$0xff] }
 0x192   : > { %v2043_v17 = vpack.c.bf16 %v711_v11, %v709_v10  ;;  %v684_v21 = vadd.f32 %v683_v15, %v2630_v16  ;;  %v2713_v10 = vld [vmem:[%s3177_s5 + $0x40] sm:$0xff]  ;;  %v2721_v11 = vld [vmem:[%s3177_s5 + $0x48] sm:$0xff]  ;;  %v2729_v12 = vld [vmem:[%s3177_s5 + $0x50] sm:$0xff] }
 0x193   : > { %v712_v26 = vmax.f32 %v682_v18, 0.0  ;;  %v2745_v15 = vld [vmem:[%s3177_s5 + $0x60] sm:$0xff]  ;;  %v2761_v18 = vld [vmem:[%s3177_s5 + $0x70] sm:$0xff] }
 0x194   : > { %v687_v22 = vpop.f32.mrb[10].mxu0  ;;  %2044 = vmatprep.subr.bf16.mxu1 %v2043_v17  ;;  %v713_v31 = vmax.f32 %v684_v21, 0.0  ;;  %v2753_v17 = vld [vmem:[%s3177_s5 + $0x68] sm:$0xff]  ;;  %v2769_v21 = vld [vmem:[%s3177_s5 + $0x78] sm:$0xff] }
 0x195   : > { %v688_v23 = vadd.f32 %v687_v22, %v2633_v20  ;;  %v689_v24 = vpop.f32.mrb[11].mxu0  ;;  %2046 = vmatpush1.bf16.msra.mxu1 %v2045_v13  ;;  %v2737_v13 = vld [vmem:[%s3177_s5 + $0x58] sm:$0xff] }
 0x196   : > { %v690_v25 = vadd.f32 %v689_v24, %v2633_v20  ;;  %v2774_v24 = vpop.permute.xlu0 %722 }
 0x197   : > { %v714_v30 = vmax.f32 %v688_v23, 0.0 }
 0x198   : > { %v715_v33 = vmax.f32 %v690_v25, 0.0  ;;  %v693_v34 = vpop.f32.mrb[12].mxu0 }
 0x199   : > { %v2049_v14 = vpack.c.bf16 %v714_v30, %v712_v26  ;;  %v695_v43 = vpop.f32.mrb[13].mxu0  ;;  %v694_v49 = vadd.f32 %v693_v34, %v2638_v44  ;;  %v2777_v26 = vpop.permute.xlu1 %727 }
 0x19a   : > { %v2047_v46 = vpack.c.bf16 %v715_v33, %v713_v31  ;;  %v696_v51 = vadd.f32 %v695_v43, %v2638_v44 }
 0x19b   : > { %v716_v56 = vmax.f32 %v694_v49, 0.0 }
 0x19c   : > { %v699_v52 = vpop.f32.mrb[14].mxu0  ;;  %2048 = vmatprep.subr.bf16.mxu1 %v2047_v46  ;;  %v717_v58 = vmax.f32 %v696_v51, 0.0 }
 0x19d   : > { %v700_v53 = vadd.f32 %v699_v52, %v2641_v50  ;;  %v701_v54 = vpop.f32.mrb[15].mxu0  ;;  %2050 = vmatpush1.bf16.msra.mxu1 %v2049_v14 }
 0x19e   : > { %v702_v55 = vadd.f32 %v701_v54, %v2641_v50 }
 0x19f   : > { %v718_v57 = vmax.f32 %v700_v53, 0.0 }
 0x1a0   : > { %v719_v59 = vmax.f32 %v702_v55, 0.0  ;;  %v2782_v55 = vpop.permute.xlu0 %732 }
 0x1a1   : > { %v2053_v60 = vpack.c.bf16 %v718_v57, %v716_v56 }
 0x1a2   : > { %v2051_v62 = vpack.c.bf16 %v719_v59, %v717_v58  ;;  %v2785_v58 = vpop.permute.xlu1 %737 }
 0x1a4   : > { %2052 = vmatprep.subr.bf16.mxu1 %v2051_v62 }
 0x1a5   : > { %2054 = vmatpush1.bf16.msra.mxu1 %v2053_v60 }
 0x1a8   : > { %1983 = vmatmul.mubr.msk.f32.vlgmr.msra.gmra.mrb[0].mxu1 %vm800_vm2, %v2649_v63 }
 0x1a9   : > { %919 = vmatprep.mubr.f32.mxu1 %v3185_v19 }
 0x1ac   : > { %1984 = vmatmul.mubr.msk.f32.gmra.mrb[2].mxu1 %vm800_vm2, %v2657_v1 }
 0x1ad   : > { %925 = vmatprep.mubr.f32.mxu1 %v3185_v19 }
 0x1b0   : > { %1985 = vmatmul.mubr.msk.f32.gmra.mrb[4].mxu1 %vm800_vm2, %v2665_v2 }
 0x1b1   : > { %931 = vmatprep.mubr.f32.mxu1 %v3185_v19 }
 0x1b4   : > { %1986 = vmatmul.mubr.msk.f32.gmra.mrb[6].mxu1 %vm800_vm2, %v2673_v3 }
 0x1b5   : > { %937 = vmatprep.mubr.f32.mxu1 %v3185_v19 }
 0x1b8   : > { %1987 = vmatmul.mubr.msk.f32.gmra.mrb[8].mxu1 %vm800_vm2, %v2681_v5 }
 0x1b9   : > { %943 = vmatprep.mubr.f32.mxu1 %v3185_v19 }
 0x1bc   : > { %1988 = vmatmul.mubr.msk.f32.gmra.mrb[10].mxu1 %vm800_vm2, %v2689_v6 }
 0x1bd   : > { %949 = vmatprep.mubr.f32.mxu1 %v3185_v19 }
 0x1c0   : > { %1989 = vmatmul.mubr.msk.f32.gmra.mrb[12].mxu1 %vm800_vm2, %v2697_v8 }
 0x1c1   : > { %955 = vmatprep.mubr.f32.mxu1 %v3185_v19 }
 0x1c4   : > { %1990 = vmatmul.mubr.msk.f32.gmra.mrb[14].mxu1 %vm800_vm2, %v2705_v9 }
 0x1c5   : > { %961 = vmatprep.mubr.f32.mxu1 %v3185_v19 }
 0x1c8   : > { %1991 = vmatmul.mubr.msk.f32.gmra.mrb[16].mxu1 %vm800_vm2, %v2713_v10 }
 0x1c9   : > { %967 = vmatprep.mubr.f32.mxu1 %v3185_v19 }
 0x1cc   : > { %1992 = vmatmul.mubr.msk.f32.gmra.mrb[18].mxu1 %vm800_vm2, %v2721_v11 }
 0x1cd   : > { %973 = vmatprep.mubr.f32.mxu1 %v3185_v19 }
 0x1d0   : > { %1993 = vmatmul.mubr.msk.f32.gmra.mrb[20].mxu1 %vm800_vm2, %v2729_v12 }
 0x1d1   : > { %979 = vmatprep.mubr.f32.mxu1 %v3185_v19 }
 0x1d4   : > { %1994 = vmatmul.mubr.msk.f32.gmra.mrb[22].mxu1 %vm800_vm2, %v2737_v13 }
 0x1d5   : > { %985 = vmatprep.mubr.f32.mxu1 %v3185_v19 }
 0x1d8   : > { %1995 = vmatmul.mubr.msk.f32.gmra.mrb[24].mxu1 %vm800_vm2, %v2745_v15 }
 0x1d9   : > { %991 = vmatprep.mubr.f32.mxu1 %v3185_v19 }
 0x1dc   : > { %1996 = vmatmul.mubr.msk.f32.gmra.mrb[26].mxu1 %vm800_vm2, %v2753_v17 }
 0x1dd   : > { %997 = vmatprep.mubr.f32.mxu1 %v3185_v19 }
 0x1e0   : > { %1997 = vmatmul.mubr.msk.f32.gmra.mrb[28].mxu1 %vm800_vm2, %v2761_v18 }
 0x1e1   : > { %1003 = vmatprep.mubr.f32.mxu1 %v3185_v19 }
 0x1e4   : > { %1998 = vmatmul.mubr.msk.f32.gmra.mrb[30].mxu1 %vm800_vm2, %v2769_v21 }
 0x1e5   : > { %1547 = vmatprep.mubr.f32.mxu1 %v3185_v19 }
 0x27b   : > { %v915_v22 = vpop.f32.mrb[0].mxu1 }
 0x27c   : > { %v917_v23 = vpop.f32.mrb[1].mxu1  ;;  %v916_v25 = vadd.f32 %v915_v22, %v2774_v24 }
 0x27d   : > { %v918_v30 = vadd.f32 %v917_v23, %v2774_v24 }
 0x27e   : > { %v1010_v43 = vmax.f32 %v916_v25, 0.0 }
 0x27f   : > { %v921_v31 = vpop.f32.mrb[2].mxu1  ;;  %v1011_v49 = vmax.f32 %v918_v30, 0.0 }
 0x280   : > { %v922_v33 = vadd.f32 %v921_v31, %v2777_v26  ;;  %v923_v34 = vpop.f32.mrb[3].mxu1 }
 0x281   : > { %v924_v14 = vadd.f32 %v923_v34, %v2777_v26 }
 0x282   : > { %v1012_v46 = vmax.f32 %v922_v33, 0.0 }
 0x283   : > { %v1013_v51 = vmax.f32 %v924_v14, 0.0  ;;  %v927_v52 = vpop.f32.mrb[4].mxu1 }
 0x284   : > { %v2057_v53 = vpack.c.bf16 %v1012_v46, %v1010_v43  ;;  %v929_v54 = vpop.f32.mrb[5].mxu1  ;;  %v928_v57 = vadd.f32 %v927_v52, %v2782_v55  ;;  %v2790_v46 = vpop.permute.xlu0 %742 }
 0x285   : > { %v2055_v56 = vpack.c.bf16 %v1013_v51, %v1011_v49  ;;  %v930_v59 = vadd.f32 %v929_v54, %v2782_v55  ;;  %v2793_v52 = vpop.permute.xlu1 %747 }
 0x286   : > { %v1014_v25 = vmax.f32 %v928_v57, 0.0  ;;  %3229 = vst [vmem:[#allocation6_spill] sm:$0xff] %v2793_v52 }
 0x287   : > { %v933_v60 = vpop.f32.mrb[6].mxu1  ;;  %2056 = vmatprep.subr.bf16.mxu0 %v2055_v56  ;;  %v1015_v31 = vmax.f32 %v930_v59, 0.0 }
 0x288   : > { %v934_v62 = vadd.f32 %v933_v60, %v2785_v58  ;;  %v935_v22 = vpop.f32.mrb[7].mxu1  ;;  %2058 = vmatpush1.bf16.msra.mxu0 %v2057_v53 }
 0x289   : > { %v936_v23 = vadd.f32 %v935_v22, %v2785_v58  ;;  %v2801_v4 = vpop.permute.xlu1 %757 }
 0x28a   : > { %v1016_v30 = vmax.f32 %v934_v62, 0.0  ;;  %3231 = vst [vmem:[#allocation8_spill] sm:$0xff] %v2801_v4 }
 0x28b   : > { %v1017_v33 = vmax.f32 %v936_v23, 0.0  ;;  %v939_v34 = vpop.f32.mrb[8].mxu1 }
 0x28c   : > { %v2061_v14 = vpack.c.bf16 %v1016_v30, %v1014_v25  ;;  %v941_v43 = vpop.f32.mrb[9].mxu1  ;;  %v940_v51 = vadd.f32 %v939_v34, %v2790_v46 }
 0x28d   : > { %v2059_v49 = vpack.c.bf16 %v1017_v33, %v1015_v31  ;;  %v942_v54 = vadd.f32 %v941_v43, %v2790_v46  ;;  %v2798_v33 = vpop.permute.xlu0 %752 }
 0x28e   : > { %v1018_v60 = vmax.f32 %v940_v51, 0.0  ;;  %3230 = vst [vmem:[#allocation7_spill] sm:$0xff] %v2798_v33 }
 0x28f   : > { %v945_v56 = vpop.f32.mrb[10].mxu1  ;;  %2060 = vmatprep.subr.bf16.mxu0 %v2059_v49  ;;  %v1019_v22 = vmax.f32 %v942_v54, 0.0 }
 0x290   : > { %v946_v53 = vadd.f32 %v945_v56, %v2793_v52  ;;  %v947_v57 = vpop.f32.mrb[11].mxu1  ;;  %2062 = vmatpush1.bf16.msra.mxu0 %v2061_v14 }
 0x291   : > { %v948_v59 = vadd.f32 %v947_v57, %v2793_v52 }
 0x292   : > { %v1020_v62 = vmax.f32 %v946_v53, 0.0 }
 0x293   : > { %v1021_v23 = vmax.f32 %v948_v59, 0.0  ;;  %v951_v25 = vpop.f32.mrb[12].mxu1 }
 0x294   : > { %v2065_v30 = vpack.c.bf16 %v1020_v62, %v1018_v60  ;;  %v953_v31 = vpop.f32.mrb[13].mxu1  ;;  %v952_v43 = vadd.f32 %v951_v25, %v2798_v33  ;;  %v2806_v25 = vpop.permute.xlu0 %762 }
 0x295   : > { %v2063_v34 = vpack.c.bf16 %v1021_v23, %v1019_v22  ;;  %v954_v49 = vadd.f32 %v953_v31, %v2798_v33  ;;  %3232 = vst [vmem:[#allocation9_spill] sm:$0xff] %v2806_v25  ;;  %v2809_v33 = vpop.permute.xlu1 %767 }
 0x296   : > { %v1022_v53 = vmax.f32 %v952_v43, 0.0  ;;  %3233 = vst [vmem:[#allocation10_spill] sm:$0xff] %v2809_v33 }
 0x297   : > { %v957_v56 = vpop.f32.mrb[14].mxu1  ;;  %2064 = vmatprep.subr.bf16.mxu0 %v2063_v34  ;;  %v1023_v59 = vmax.f32 %v954_v49, 0.0 }
 0x298   : > { %v958_v14 = vadd.f32 %v957_v56, %v2801_v4  ;;  %v959_v51 = vpop.f32.mrb[15].mxu1  ;;  %2066 = vmatpush1.bf16.msra.mxu0 %v2065_v30 }
 0x299   : > { %v960_v54 = vadd.f32 %v959_v51, %v2801_v4 }
 0x29a   : > { %v1024_v57 = vmax.f32 %v958_v14, 0.0 }
 0x29b   : > { %v1025_v60 = vmax.f32 %v960_v54, 0.0  ;;  %v963_v62 = vpop.f32.mrb[16].mxu1 }
 0x29c   : > { %v2069_v22 = vpack.c.bf16 %v1024_v57, %v1022_v53  ;;  %v965_v23 = vpop.f32.mrb[17].mxu1  ;;  %v964_v31 = vadd.f32 %v963_v62, %v2806_v25  ;;  %v2814_v62 = vpop.permute.xlu0 %772 }
 0x29d   : > { %v2067_v19 = vpack.c.bf16 %v1025_v60, %v1023_v59  ;;  %v966_v34 = vadd.f32 %v965_v23, %v2806_v25  ;;  %3234 = vst [vmem:[#allocation11_spill] sm:$0xff] %v2814_v62  ;;  %v2817_v25 = vpop.permute.xlu1 %777 }
 0x29e   : > { %v1026_v14 = vmax.f32 %v964_v31, 0.0  ;;  %3235 = vst [vmem:[#allocation12_spill] sm:$0xff] %v2817_v25 }
 0x29f   : > { %v969_v56 = vpop.f32.mrb[18].mxu1  ;;  %2068 = vmatprep.subr.bf16.mxu0 %v2067_v19  ;;  %v1027_v54 = vmax.f32 %v966_v34, 0.0 }
 0x2a0   : > { %v970_v30 = vadd.f32 %v969_v56, %v2809_v33  ;;  %v971_v43 = vpop.f32.mrb[19].mxu1  ;;  %2070 = vmatpush1.bf16.msra.mxu0 %v2069_v22 }
 0x2a1   : > { %v972_v49 = vadd.f32 %v971_v43, %v2809_v33 }
 0x2a2   : > { %v1028_v51 = vmax.f32 %v970_v30, 0.0 }
 0x2a3   : > { %v1029_v53 = vmax.f32 %v972_v49, 0.0  ;;  %v975_v57 = vpop.f32.mrb[20].mxu1 }
 0x2a4   : > { %v2073_v59 = vpack.c.bf16 %v1028_v51, %v1026_v14  ;;  %v977_v60 = vpop.f32.mrb[21].mxu1  ;;  %v976_v23 = vadd.f32 %v975_v57, %v2814_v62  ;;  %v2822_v57 = vpop.permute.xlu0 %782 }
 0x2a5   : > { %v2071_v4 = vpack.c.bf16 %v1029_v53, %v1027_v54  ;;  %v978_v19 = vadd.f32 %v977_v60, %v2814_v62  ;;  %3236 = vst [vmem:[#allocation13_spill] sm:$0xff] %v2822_v57  ;;  %v2825_v62 = vpop.permute.xlu1 %787 }
 0x2a6   : > { %v1030_v30 = vmax.f32 %v976_v23, 0.0  ;;  %3237 = vst [vmem:[#allocation14_spill] sm:$0xff] %v2825_v62 }
 0x2a7   : > { %v981_v56 = vpop.f32.mrb[22].mxu1  ;;  %2072 = vmatprep.subr.bf16.mxu0 %v2071_v4  ;;  %v1031_v49 = vmax.f32 %v978_v19, 0.0 }
 0x2a8   : > { %v982_v22 = vadd.f32 %v981_v56, %v2817_v25  ;;  %v983_v31 = vpop.f32.mrb[23].mxu1  ;;  %2074 = vmatpush1.bf16.msra.mxu0 %v2073_v59 }
 0x2a9   : > { %v984_v34 = vadd.f32 %v983_v31, %v2817_v25 }
 0x2aa   : > { %v1032_v43 = vmax.f32 %v982_v22, 0.0 }
 0x2ab   : > { %v1033_v14 = vmax.f32 %v984_v34, 0.0  ;;  %v987_v51 = vpop.f32.mrb[24].mxu1 }
 0x2ac   : > { %v2077_v54 = vpack.c.bf16 %v1032_v43, %v1030_v30  ;;  %v989_v53 = vpop.f32.mrb[25].mxu1  ;;  %v988_v60 = vadd.f32 %v987_v51, %v2822_v57  ;;  %v2830_v51 = vpop.permute.xlu0 %792 }
 0x2ad   : > { %v2075_v33 = vpack.c.bf16 %v1033_v14, %v1031_v49  ;;  %v990_v4 = vadd.f32 %v989_v53, %v2822_v57  ;;  %3238 = vst [vmem:[#allocation15_spill] sm:$0xff] %v2830_v51  ;;  %v2833_v57 = vpop.permute.xlu1 %797 }
 0x2ae   : > { %v1034_v22 = vmax.f32 %v988_v60, 0.0  ;;  %3239 = vst [vmem:[#allocation16_spill] sm:$0xff] %v2833_v57 }
 0x2af   : > { %v993_v56 = vpop.f32.mrb[26].mxu1  ;;  %2076 = vmatprep.subr.bf16.mxu0 %v2075_v33  ;;  %v1035_v34 = vmax.f32 %v990_v4, 0.0 }
 0x2b0   : > { %v994_v59 = vadd.f32 %v993_v56, %v2825_v62  ;;  %v995_v23 = vpop.f32.mrb[27].mxu1  ;;  %2078 = vmatpush1.bf16.msra.mxu0 %v2077_v54 }
 0x2b1   : > { %v996_v19 = vadd.f32 %v995_v23, %v2825_v62 }
 0x2b2   : > { %v1036_v31 = vmax.f32 %v994_v59, 0.0 }
 0x2b3   : > { %v1037_v30 = vmax.f32 %v996_v19, 0.0  ;;  %v999_v43 = vpop.f32.mrb[28].mxu1 }
 0x2b4   : > { %v2081_v49 = vpack.c.bf16 %v1036_v31, %v1034_v22  ;;  %v1001_v14 = vpop.f32.mrb[29].mxu1  ;;  %v1000_v53 = vadd.f32 %v999_v43, %v2830_v51  ;;  %v2848_v43 = vld [vmem:[%s3179_s7 + $0x8] sm:$0xff] }
 0x2b5   : > { %v2079_v25 = vpack.c.bf16 %v1037_v30, %v1035_v34  ;;  %v1002_v33 = vadd.f32 %v1001_v14, %v2830_v51  ;;  %v2841_v30 = vld [vmem:[%s3179_s7] sm:$0xff]  ;;  %3242 = vst [vmem:[#allocation18_spill] sm:$0xff] %v2848_v43  ;;  %v2862_v14 = vld [vmem:[%s3179_s7 + $0x18] sm:$0xff] }
 0x2b6   : > { %v1038_v59 = vmax.f32 %v1000_v53, 0.0  ;;  %3240 = vst [vmem:[#allocation17_spill] sm:$0xff] %v2841_v30  ;;  %3244 = vst [vmem:[#allocation20_spill] sm:$0xff] %v2862_v14  ;;  %v2869_v53 = vld [vmem:[%s3179_s7 + $0x20] sm:$0xff] }
 0x2b7   : > { %v1005_v56 = vpop.f32.mrb[30].mxu1  ;;  %2080 = vmatprep.subr.bf16.mxu0 %v2079_v25  ;;  %v1039_v19 = vmax.f32 %v1002_v33, 0.0  ;;  %v3241_v25 = vmov 0.0   ;;  %3245 = vst [vmem:[#allocation21_spill] sm:$0xff] %v2869_v53  ;;  %v2876_v33 = vld [vmem:[%s3179_s7 + $0x28] sm:$0xff] }
 0x2b8   : > { %v1006_v54 = vadd.f32 %v1005_v56, %v2833_v57  ;;  %v1007_v60 = vpop.f32.mrb[31].mxu1  ;;  %2082 = vmatpush1.bf16.msra.mxu0 %v2081_v49  ;;  %v2855_v49 = vld [vmem:[%s3179_s7 + $0x10] sm:$0xff]  ;;  %3246 = vst [vmem:[#allocation22_spill] sm:$0xff] %v2876_v33 }
 0x2b9   : > { %v1008_v4 = vadd.f32 %v1007_v60, %v2833_v57  ;;  %3243 = vst [vmem:[#allocation19_spill] sm:$0xff] %v2855_v49  ;;  %v2883_v56 = vld [vmem:[%s3179_s7 + $0x30] sm:$0xff] }
 0x2ba   : > { %v1040_v23 = vmax.f32 %v1006_v54, 0.0  ;;  %3247 = vst [vmem:[#allocation23_spill] sm:$0xff] %v2883_v56  ;;  %v2890_v54 = vld [vmem:[%s3179_s7 + $0x38] sm:$0xff] }
 0x2bb   : > { %v1041_v22 = vmax.f32 %v1008_v4, 0.0  ;;  %3248 = vst [vmem:[#allocation24_spill] sm:$0xff] %v2890_v54 }
 0x2bc   : > { %v2085_v31 = vpack.c.bf16 %v1040_v23, %v1038_v59  ;;  %v2894_v59 = vpop.permute.xlu0 %1044 }
 0x2bd   : > { %v2083_v34 = vpack.c.bf16 %v1041_v22, %v1039_v19  ;;  %3249 = vst [vmem:[#allocation25_spill] sm:$0xff] %v2894_v59  ;;  %v2897_v19 = vpop.permute.xlu1 %1049 }
 0x2be   : > { %3250 = vst [vmem:[#allocation26_spill] sm:$0xff] %v2897_v19 }
 0x2bf   : > { %2084 = vmatprep.subr.bf16.mxu0 %v2083_v34 }
 0x2c0   : > { %2086 = vmatpush1.bf16.msra.mxu0 %v2085_v31  ;;  %v2902_v51 = vpop.permute.xlu0 %1054 }
 0x2c1   : > { %3251 = vst [vmem:[#allocation27_spill] sm:$0xff] %v2902_v51  ;;  %v2905_v52 = vpop.permute.xlu1 %1059 }
 0x2c2   : > { %3252 = vst [vmem:[#allocation28_spill] sm:$0xff] %v2905_v52 }
 0x2c3   : > { %1147 = vmatmul.mubr.f32.vlgmr.msra.gmra.mrb[16].mxu0 %v2841_v30 }
 0x2c4   : > { %1152 = vmatprep.mubr.f32.mxu0 %v3241_v25 }
 0x2c7   : > { %1153 = vmatmul.mubr.f32.gmra.mrb[18].mxu0 %v2848_v43 }
 0x2c8   : > { %1158 = vmatprep.mubr.f32.mxu0 %v3241_v25 }
 0x2cb   : > { %1159 = vmatmul.mubr.f32.gmra.mrb[20].mxu0 %v2855_v49 }
 0x2cc   : > { %1164 = vmatprep.mubr.f32.mxu0 %v3241_v25 }
 0x2cf   : > { %1165 = vmatmul.mubr.f32.gmra.mrb[22].mxu0 %v2862_v14 }
 0x2d0   : > { %1170 = vmatprep.mubr.f32.mxu0 %v3241_v25 }
 0x2d3   : > { %1171 = vmatmul.mubr.f32.gmra.mrb[24].mxu0 %v2869_v53 }
 0x2d4   : > { %1176 = vmatprep.mubr.f32.mxu0 %v3241_v25 }
 0x2d7   : > { %1177 = vmatmul.mubr.f32.gmra.mrb[26].mxu0 %v2876_v33 }
 0x2d8   : > { %1182 = vmatprep.mubr.f32.mxu0 %v3241_v25 }
 0x2db   : > { %1183 = vmatmul.mubr.f32.gmra.mrb[28].mxu0 %v2883_v56 }
 0x2dc   : > { %1188 = vmatprep.mubr.f32.mxu0 %v3241_v25 }
 0x2df   : > { %1189 = vmatmul.mubr.f32.gmra.mrb[30].mxu0 %v2890_v54 }
 0x2e0   : > { %1287 = vmatprep.mubr.f32.mxu0 %v3241_v25 }
 0x396   : > { %v1148_v60 = vpop.f32.mrb[16].mxu0 }
 0x397   : > { %v1150_v4 = vpop.f32.mrb[17].mxu0  ;;  %v1149_v23 = vadd.f32 %v1148_v60, %v2894_v59 }
 0x398   : > { %v1151_v22 = vadd.f32 %v1150_v4, %v2894_v59 }
 0x399   : > { %v1195_v53 = vmax.f32 %v1149_v23, 0.0 }
 0x39a   : > { %v1154_v31 = vpop.f32.mrb[18].mxu0  ;;  %v1196_v14 = vmax.f32 %v1151_v22, 0.0 }
 0x39b   : > { %v1155_v34 = vadd.f32 %v1154_v31, %v2897_v19  ;;  %v1156_v56 = vpop.f32.mrb[19].mxu0 }
 0x39c   : > { %v1157_v33 = vadd.f32 %v1156_v56, %v2897_v19 }
 0x39d   : > { %v1197_v54 = vmax.f32 %v1155_v34, 0.0 }
 0x39e   : > { %v1198_v49 = vmax.f32 %v1157_v33, 0.0  ;;  %v1160_v43 = vpop.f32.mrb[20].mxu0 }
 0x39f   : > { %v2089_v30 = vpack.c.bf16 %v1197_v54, %v1195_v53  ;;  %v1162_v57 = vpop.f32.mrb[21].mxu0  ;;  %v1161_v62 = vadd.f32 %v1160_v43, %v2902_v51  ;;  %v2910_v43 = vpop.permute.xlu0 %1064 }
 0x3a0   : > { %v2087_v60 = vpack.c.bf16 %v1198_v49, %v1196_v14  ;;  %v1163_v4 = vadd.f32 %v1162_v57, %v2902_v51  ;;  %3253 = vst [vmem:[#allocation29_spill] sm:$0xff] %v2910_v43  ;;  %v2913_v51 = vpop.permute.xlu1 %1069 }
 0x3a1   : > { %v1199_v22 = vmax.f32 %v1161_v62, 0.0 }
 0x3a2   : > { %v1166_v31 = vpop.f32.mrb[22].mxu0  ;;  %2088 = vmatprep.subr.bf16.mxu0 %v2087_v60  ;;  %v1200_v54 = vmax.f32 %v1163_v4, 0.0 }
 0x3a3   : > { %v1167_v56 = vadd.f32 %v1166_v31, %v2905_v52  ;;  %v1168_v23 = vpop.f32.mrb[23].mxu0  ;;  %2090 = vmatpush1.bf16.msra.mxu0 %v2089_v30 }
 0x3a4   : > { %v1169_v33 = vadd.f32 %v1168_v23, %v2905_v52 }
 0x3a5   : > { %v1201_v53 = vmax.f32 %v1167_v56, 0.0 }
 0x3a6   : > { %v1202_v34 = vmax.f32 %v1169_v33, 0.0  ;;  %v1172_v19 = vpop.f32.mrb[24].mxu0 }
 0x3a7   : > { %v2093_v49 = vpack.c.bf16 %v1201_v53, %v1199_v22  ;;  %v1174_v14 = vpop.f32.mrb[25].mxu0  ;;  %v1173_v57 = vadd.f32 %v1172_v19, %v2910_v43  ;;  %v2918_v19 = vpop.permute.xlu0 %1074 }
 0x3a8   : > { %v2091_v59 = vpack.c.bf16 %v1202_v34, %v1200_v54  ;;  %v1175_v60 = vadd.f32 %v1174_v14, %v2910_v43  ;;  %v2921_v43 = vpop.permute.xlu1 %1079 }
 0x3a9   : > { %v1203_v56 = vmax.f32 %v1173_v57, 0.0 }
 0x3aa   : > { %v1178_v31 = vpop.f32.mrb[26].mxu0  ;;  %2092 = vmatprep.subr.bf16.mxu0 %v2091_v59  ;;  %v1204_v33 = vmax.f32 %v1175_v60, 0.0 }
 0x3ab   : > { %v1179_v30 = vadd.f32 %v1178_v31, %v2913_v51  ;;  %v1180_v62 = vpop.f32.mrb[27].mxu0  ;;  %2094 = vmatpush1.bf16.msra.mxu0 %v2093_v49 }
 0x3ac   : > { %v1181_v4 = vadd.f32 %v1180_v62, %v2913_v51 }
 0x3ad   : > { %v1205_v23 = vmax.f32 %v1179_v30, 0.0 }
 0x3ae   : > { %v1206_v22 = vmax.f32 %v1181_v4, 0.0  ;;  %v1184_v53 = vpop.f32.mrb[28].mxu0 }
 0x3af   : > { %v2097_v54 = vpack.c.bf16 %v1205_v23, %v1203_v56  ;;  %v1186_v34 = vpop.f32.mrb[29].mxu0  ;;  %v1185_v14 = vadd.f32 %v1184_v53, %v2918_v19  ;;  %v1346_v53 = vmax.f32 %v2540_v27, 0.0  ;;  %v2281_v27 = vmov 1966171168  }
 0x3b0   : > { %v2095_v52 = vpack.c.bf16 %v1206_v22, %v1204_v33  ;;  %v1187_v59 = vadd.f32 %v1186_v34, %v2918_v19  ;;  %v2929_v22 = vld [vmem:[%s3181_s9] sm:$0x1] }
 0x3b1   : > { %v1207_v30 = vmax.f32 %v1185_v14, 0.0  ;;  %v3254_v14 = vlaneseq }
 0x3b2   : > { %v1190_v31 = vpop.f32.mrb[30].mxu0  ;;  %2096 = vmatprep.subr.bf16.mxu0 %v2095_v52  ;;  %v1208_v4 = vmax.f32 %v1187_v59, 0.0  ;;  %v1347_v52 = vmax.f32 %v2544_v29, 0.0  ;;  %v1214_v29 = vpop.permute.xlu0 %1213 }
 0x3b3   : > { %v1191_v49 = vadd.f32 %v1190_v31, %v2921_v43  ;;  %v1192_v57 = vpop.f32.mrb[31].mxu0  ;;  %2098 = vmatpush1.bf16.msra.mxu0 %v2097_v54  ;;  %vm2977_vm3 = vcmp.lt.s32.totalorder %v3254_v14, 256 }
 0x3b4   : > { %v1193_v60 = vadd.f32 %v1192_v57, %v2921_v43 }
 0x3b5   : > { %v1209_v62 = vmax.f32 %v1191_v49, 0.0 }
 0x3b6   : > { %v1210_v56 = vmax.f32 %v1193_v60, 0.0 }
 0x3b7   : > { %v2101_v23 = vpack.c.bf16 %v1209_v62, %v1207_v30 }
 0x3b8   : > { %v2099_v33 = vpack.c.bf16 %v1210_v56, %v1208_v4 }
 0x3ba   : > { %2100 = vmatprep.subr.bf16.mxu0 %v2099_v33 }
 0x3bb   : > { %2102 = vmatpush1.bf16.msra.mxu0 %v2101_v23 }
 0x3bc   : > { %2104 = vmatprep.subr.bf16.mxu0 %v2546_v32 }
 0x3be   : > { %1999 = vmatmul.mubr.msk.f32.vlgmr.msra.gmra.mrb[32].mxu0 %vm800_vm2, %v2929_v22 }
 0x3bf   : > { %2106 = vmatpush1.bf16.msra.mxu0 %v2542_v28  ;;  %1418 = vmatprep.mubr.f32.mxu0 %v3241_v25  ;;  %v1298_v28 = vunpack.c.l.s4 %v2281_v27 }
 0x3c0   : > { %2001 = vmatprep.subr.msk.mxu0 %vm584_vm0, %v1347_v52 }
 0x3c1   : > { %v1299_v32 = vunpack.c.0.s8 %v1298_v28 }
 0x3c3   : > { %2002 = vmatpush1.msk.msra.mxu0 %vm584_vm0, %v1346_v53 }
 0x3c4   : > { %2003 = vmatmul.mubr.msk.f32.vlgmr.msra.gmra.mrb[34].mxu0 %vm559_vm1, %v2552_v35  ;;  %v2965_v35 = vrot.slane %v1214_v29, %v2529_v47 }
 0x3c5   : > { %1424 = vmatprep.mubr.f32.mxu0 %v3241_v25 }
 0x3c8   : > { %2004 = vmatmul.mubr.msk.f32.gmra.mrb[36].mxu0 %vm559_vm1, %v2561_v36 }
 0x3c9   : > { %1430 = vmatprep.mubr.f32.mxu0 %v3241_v25 }
 0x3cc   : > { %2005 = vmatmul.mubr.msk.f32.gmra.mrb[38].mxu0 %vm559_vm1, %v2569_v37 }
 0x3cd   : > { %1436 = vmatprep.mubr.f32.mxu0 %v3241_v25 }
 0x3d0   : > { %2006 = vmatmul.mubr.msk.f32.gmra.mrb[40].mxu0 %vm559_vm1, %v2577_v38 }
 0x3d1   : > { %1442 = vmatprep.mubr.f32.mxu0 %v3241_v25 }
 0x3d4   : > { %2007 = vmatmul.mubr.msk.f32.gmra.mrb[42].mxu0 %vm559_vm1, %v2585_v39 }
 0x3d5   : > { %1448 = vmatprep.mubr.f32.mxu0 %v3241_v25 }
 0x3d8   : > { %2008 = vmatmul.mubr.msk.f32.gmra.mrb[44].mxu0 %vm559_vm1, %v2593_v40  ;;  %v2971_v40 = vsub.s32 %v1299_v32, %v2408_v7 }
 0x3d9   : > { %1454 = vmatprep.mubr.f32.mxu0 %v3241_v25 }
 0x3dc   : > { %2009 = vmatmul.mubr.msk.f32.gmra.mrb[46].mxu0 %vm559_vm1, %v2601_v41 }
 0x3dd   : > { %1460 = vmatprep.mubr.f32.mxu0 %v3241_v25 }
 0x3e0   : > { %2010 = vmatmul.mubr.msk.f32.gmra.mrb[48].mxu0 %vm559_vm1, %v2609_v42 }
 0x3e1   : > { %1740 = vmatprep.mubr.f32.mxu0 %v3241_v25 }
 0x491   : > { %v1289_v36 = vpop.f32.mrb[32].mxu0 }
 0x492   : > { %v1290_v37 = vadd.f32 %v1289_v36, %v2965_v35  ;;  %v1291_v38 = vpop.f32.mrb[33].mxu0 }
 0x493   : > { %v1292_v39 = vadd.f32 %v1291_v38, %v2965_v35 }
 0x495   : > { %v1296_v41 = vcombine.low %v1290_v37, %v1292_v39 }
 0x497   : > { %v1303_v42 = vrot.slane %v1296_v41, %v2971_v40  ;;  %v1420_v54 = vpop.f32.mrb[34].mxu0 }
 0x498   : > { %v1422_v34 = vpop.f32.mrb[35].mxu0  ;;  %v1421_v31 = vadd.f32 %v1420_v54, %v2614_v45 }
 0x499   : > { %v1310_v59 = vrot.slane %v1303_v42, %v2971_v40  ;;  %v1423_v49 = vadd.f32 %v1422_v34, %v2614_v45 }
 0x49a   : > { %v1467_v62 = vmax.f32 %v1421_v31, 0.0 }
 0x49b   : > { %v1426_v7 = vpop.f32.mrb[36].mxu0  ;;  %1316 = vst.msk [vmem:[%s2984_s26] sm:$0x3] %vm2977_vm3, %v1310_v59  ;;  %v1468_v56 = vmax.f32 %v1423_v49, 0.0 }
 0x49c   : > { %v1427_v57 = vadd.f32 %v1426_v7, %v2617_v48  ;;  %v1428_v60 = vpop.f32.mrb[37].mxu0 }
 0x49d   : > { %v1429_v30 = vadd.f32 %v1428_v60, %v2617_v48 }
 0x49e   : > { %v1469_v4 = vmax.f32 %v1427_v57, 0.0 }
 0x49f   : > { %v1470_v23 = vmax.f32 %v1429_v30, 0.0  ;;  %v1432_v33 = vpop.f32.mrb[38].mxu0 }
 0x4a0   : > { %v2109_v52 = vpack.c.bf16 %v1469_v4, %v1467_v62  ;;  %v1434_v53 = vpop.f32.mrb[39].mxu0  ;;  %v1433_v27 = vadd.f32 %v1432_v33, %v2622_v61 }
 0x4a1   : > { %v2107_v45 = vpack.c.bf16 %v1470_v23, %v1468_v56  ;;  %v1435_v28 = vadd.f32 %v1434_v53, %v2622_v61 }
 0x4a2   : > { %v1471_v37 = vmax.f32 %v1433_v27, 0.0 }
 0x4a3   : > { %v1438_v29 = vpop.f32.mrb[40].mxu0  ;;  %2108 = vmatprep.subr.bf16.mxu1 %v2107_v45  ;;  %v1472_v39 = vmax.f32 %v1435_v28, 0.0 }
 0x4a4   : > { %v1439_v32 = vadd.f32 %v1438_v29, %v2625_v0  ;;  %v1440_v36 = vpop.f32.mrb[41].mxu0  ;;  %2110 = vmatpush1.bf16.msra.mxu1 %v2109_v52 }
 0x4a5   : > { %v1441_v48 = vadd.f32 %v1440_v36, %v2625_v0 }
 0x4a6   : > { %v1473_v38 = vmax.f32 %v1439_v32, 0.0 }
 0x4a7   : > { %v1474_v41 = vmax.f32 %v1441_v48, 0.0  ;;  %v1444_v42 = vpop.f32.mrb[42].mxu0 }
 0x4a8   : > { %v2113_v54 = vpack.c.bf16 %v1473_v38, %v1471_v37  ;;  %v1446_v34 = vpop.f32.mrb[43].mxu0  ;;  %v1445_v59 = vadd.f32 %v1444_v42, %v2630_v16 }
 0x4a9   : > { %v2111_v14 = vpack.c.bf16 %v1474_v41, %v1472_v39  ;;  %v1447_v61 = vadd.f32 %v1446_v34, %v2630_v16 }
 0x4aa   : > { %v1475_v57 = vmax.f32 %v1445_v59, 0.0 }
 0x4ab   : > { %v1450_v31 = vpop.f32.mrb[44].mxu0  ;;  %2112 = vmatprep.subr.bf16.mxu1 %v2111_v14  ;;  %v1476_v30 = vmax.f32 %v1447_v61, 0.0 }
 0x4ac   : > { %v1451_v49 = vadd.f32 %v1450_v31, %v2633_v20  ;;  %v1452_v7 = vpop.f32.mrb[45].mxu0  ;;  %2114 = vmatpush1.bf16.msra.mxu1 %v2113_v54 }
 0x4ad   : > { %v1453_v0 = vadd.f32 %v1452_v7, %v2633_v20 }
 0x4ae   : > { %v1477_v60 = vmax.f32 %v1451_v49, 0.0 }
 0x4af   : > { %v1478_v62 = vmax.f32 %v1453_v0, 0.0  ;;  %v1456_v4 = vpop.f32.mrb[46].mxu0  ;;  %v3257_v0 = vld [vmem:[#allocation6_spill] sm:$0xff] }
 0x4b0   : > { %v2117_v56 = vpack.c.bf16 %v1477_v60, %v1475_v57  ;;  %v1458_v23 = vpop.f32.mrb[47].mxu0  ;;  %v1457_v52 = vadd.f32 %v1456_v4, %v2638_v44 }
 0x4b1   : > { %v2115_v33 = vpack.c.bf16 %v1478_v62, %v1476_v30  ;;  %v1459_v16 = vadd.f32 %v1458_v23, %v2638_v44 }
 0x4b2   : > { %v1479_v28 = vmax.f32 %v1457_v52, 0.0 }
 0x4b3   : > { %v1462_v53 = vpop.f32.mrb[48].mxu0  ;;  %2116 = vmatprep.subr.bf16.mxu1 %v2115_v33  ;;  %v1480_v32 = vmax.f32 %v1459_v16, 0.0 }
 0x4b4   : > { %v1463_v45 = vadd.f32 %v1462_v53, %v2641_v50  ;;  %v1464_v27 = vpop.f32.mrb[49].mxu0  ;;  %2118 = vmatpush1.bf16.msra.mxu1 %v2117_v56  ;;  %v3258_v53 = vld [vmem:[#allocation7_spill] sm:$0xff] }
 0x4b5   : > { %v1465_v20 = vadd.f32 %v1464_v27, %v2641_v50 }
 0x4b6   : > { %v1481_v29 = vmax.f32 %v1463_v45, 0.0 }
 0x4b7   : > { %v1482_v36 = vmax.f32 %v1465_v20, 0.0  ;;  %v3259_v20 = vld [vmem:[#allocation8_spill] sm:$0xff] }
 0x4b8   : > { %v2121_v48 = vpack.c.bf16 %v1481_v29, %v1479_v28 }
 0x4b9   : > { %v2119_v37 = vpack.c.bf16 %v1482_v36, %v1480_v32 }
 0x4bb   : > { %2120 = vmatprep.subr.bf16.mxu1 %v2119_v37 }
 0x4bc   : > { %2122 = vmatpush1.bf16.msra.mxu1 %v2121_v48 }
 0x4bf   : > { %2011 = vmatmul.mubr.msk.f32.vlgmr.msra.gmra.mrb[32].mxu1 %vm800_vm2, %v2649_v63 }
 0x4c0   : > { %1553 = vmatprep.mubr.f32.mxu1 %v3241_v25 }
 0x4c3   : > { %2012 = vmatmul.mubr.msk.f32.gmra.mrb[34].mxu1 %vm800_vm2, %v2657_v1 }
 0x4c4   : > { %1559 = vmatprep.mubr.f32.mxu1 %v3241_v25 }
 0x4c7   : > { %2013 = vmatmul.mubr.msk.f32.gmra.mrb[36].mxu1 %vm800_vm2, %v2665_v2 }
 0x4c8   : > { %1565 = vmatprep.mubr.f32.mxu1 %v3241_v25 }
 0x4cb   : > { %2014 = vmatmul.mubr.msk.f32.gmra.mrb[38].mxu1 %vm800_vm2, %v2673_v3 }
 0x4cc   : > { %1571 = vmatprep.mubr.f32.mxu1 %v3241_v25 }
 0x4cf   : > { %2015 = vmatmul.mubr.msk.f32.gmra.mrb[40].mxu1 %vm800_vm2, %v2681_v5 }
 0x4d0   : > { %1577 = vmatprep.mubr.f32.mxu1 %v3241_v25 }
 0x4d3   : > { %2016 = vmatmul.mubr.msk.f32.gmra.mrb[42].mxu1 %vm800_vm2, %v2689_v6 }
 0x4d4   : > { %1583 = vmatprep.mubr.f32.mxu1 %v3241_v25 }
 0x4d7   : > { %2017 = vmatmul.mubr.msk.f32.gmra.mrb[44].mxu1 %vm800_vm2, %v2697_v8 }
 0x4d8   : > { %1589 = vmatprep.mubr.f32.mxu1 %v3241_v25 }
 0x4db   : > { %2018 = vmatmul.mubr.msk.f32.gmra.mrb[46].mxu1 %vm800_vm2, %v2705_v9 }
 0x4dc   : > { %1595 = vmatprep.mubr.f32.mxu1 %v3241_v25 }
 0x4df   : > { %2019 = vmatmul.mubr.msk.f32.gmra.mrb[48].mxu1 %vm800_vm2, %v2713_v10 }
 0x4e0   : > { %1601 = vmatprep.mubr.f32.mxu1 %v3241_v25 }
 0x4e3   : > { %2020 = vmatmul.mubr.msk.f32.gmra.mrb[50].mxu1 %vm800_vm2, %v2721_v11 }
 0x4e4   : > { %1607 = vmatprep.mubr.f32.mxu1 %v3241_v25 }
 0x4e7   : > { %2021 = vmatmul.mubr.msk.f32.gmra.mrb[52].mxu1 %vm800_vm2, %v2729_v12 }
 0x4e8   : > { %1613 = vmatprep.mubr.f32.mxu1 %v3241_v25 }
 0x4eb   : > { %2022 = vmatmul.mubr.msk.f32.gmra.mrb[54].mxu1 %vm800_vm2, %v2737_v13 }
 0x4ec   : > { %1619 = vmatprep.mubr.f32.mxu1 %v3241_v25 }
 0x4ef   : > { %2023 = vmatmul.mubr.msk.f32.gmra.mrb[56].mxu1 %vm800_vm2, %v2745_v15 }
 0x4f0   : > { %1625 = vmatprep.mubr.f32.mxu1 %v3241_v25 }
 0x4f3   : > { %2024 = vmatmul.mubr.msk.f32.gmra.mrb[58].mxu1 %vm800_vm2, %v2753_v17 }
 0x4f4   : > { %1631 = vmatprep.mubr.f32.mxu1 %v3241_v25 }
 0x4f7   : > { %2025 = vmatmul.mubr.msk.f32.gmra.mrb[60].mxu1 %vm800_vm2, %v2761_v18 }
 0x4f8   : > { %1637 = vmatprep.mubr.f32.mxu1 %v3241_v25 }
 0x4fb   : > { %2026 = vmatmul.mubr.msk.f32.gmra.mrb[62].mxu1 %vm800_vm2, %v2769_v21 }
 0x592   : > { %v1549_v44 = vpop.f32.mrb[32].mxu1 }
 0x593   : > { %v1551_v50 = vpop.f32.mrb[33].mxu1  ;;  %v1550_v63 = vadd.f32 %v1549_v44, %v2774_v24 }
 0x594   : > { %v1552_v1 = vadd.f32 %v1551_v50, %v2774_v24 }
 0x595   : > { %v1644_v8 = vmax.f32 %v1550_v63, 0.0 }
 0x596   : > { %v1555_v2 = vpop.f32.mrb[34].mxu1  ;;  %v1645_v10 = vmax.f32 %v1552_v1, 0.0 }
 0x597   : > { %v1556_v3 = vadd.f32 %v1555_v2, %v2777_v26  ;;  %v1557_v5 = vpop.f32.mrb[35].mxu1 }
 0x598   : > { %v1558_v6 = vadd.f32 %v1557_v5, %v2777_v26 }
 0x599   : > { %v1646_v9 = vmax.f32 %v1556_v3, 0.0  ;;  %v3260_v3 = vld [vmem:[#allocation9_spill] sm:$0xff] }
 0x59a   : > { %v1647_v11 = vmax.f32 %v1558_v6, 0.0  ;;  %v1561_v12 = vpop.f32.mrb[36].mxu1 }
 0x59b   : > { %v2125_v13 = vpack.c.bf16 %v1646_v9, %v1644_v8  ;;  %v1563_v15 = vpop.f32.mrb[37].mxu1  ;;  %v1562_v18 = vadd.f32 %v1561_v12, %v2782_v55  ;;  %v3261_v9 = vld [vmem:[#allocation10_spill] sm:$0xff] }
 0x59c   : > { %v2123_v17 = vpack.c.bf16 %v1647_v11, %v1645_v10  ;;  %v1564_v21 = vadd.f32 %v1563_v15, %v2782_v55 }
 0x59d   : > { %v1648_v41 = vmax.f32 %v1562_v18, 0.0 }
 0x59e   : > { %v1567_v38 = vpop.f32.mrb[38].mxu1  ;;  %2124 = vmatprep.subr.bf16.mxu0 %v2123_v17  ;;  %v1649_v54 = vmax.f32 %v1564_v21, 0.0 }
 0x59f   : > { %v1568_v24 = vadd.f32 %v1567_v38, %v2785_v58  ;;  %v1569_v39 = vpop.f32.mrb[39].mxu1  ;;  %2126 = vmatpush1.bf16.msra.mxu0 %v2125_v13 }
 0x5a0   : > { %v1570_v26 = vadd.f32 %v1569_v39, %v2785_v58 }
 0x5a1   : > { %v1650_v42 = vmax.f32 %v1568_v24, 0.0 }
 0x5a2   : > { %v1651_v34 = vmax.f32 %v1570_v26, 0.0  ;;  %v1573_v14 = vpop.f32.mrb[40].mxu1  ;;  %v3262_v26 = vld [vmem:[#allocation11_spill] sm:$0xff] }
 0x5a3   : > { %v2129_v59 = vpack.c.bf16 %v1650_v42, %v1648_v41  ;;  %v1575_v61 = vpop.f32.mrb[41].mxu1  ;;  %v1574_v49 = vadd.f32 %v1573_v14, %v2790_v46 }
 0x5a4   : > { %v2127_v31 = vpack.c.bf16 %v1651_v34, %v1649_v54  ;;  %v1576_v55 = vadd.f32 %v1575_v61, %v2790_v46  ;;  %v3263_v34 = vld [vmem:[#allocation12_spill] sm:$0xff] }
 0x5a5   : > { %v1652_v30 = vmax.f32 %v1574_v49, 0.0 }
 0x5a6   : > { %v1579_v7 = vpop.f32.mrb[42].mxu1  ;;  %2128 = vmatprep.subr.bf16.mxu0 %v2127_v31  ;;  %v1653_v4 = vmax.f32 %v1576_v55, 0.0 }
 0x5a7   : > { %v1580_v57 = vadd.f32 %v1579_v7, %v3257_v0  ;;  %v1581_v60 = vpop.f32.mrb[43].mxu1  ;;  %2130 = vmatpush1.bf16.msra.mxu0 %v2129_v59 }
 0x5a8   : > { %v1582_v58 = vadd.f32 %v1581_v60, %v3257_v0 }
 0x5a9   : > { %v1654_v62 = vmax.f32 %v1580_v57, 0.0 }
 0x5aa   : > { %v1655_v56 = vmax.f32 %v1582_v58, 0.0  ;;  %v1585_v23 = vpop.f32.mrb[44].mxu1 }
 0x5ab   : > { %v2133_v33 = vpack.c.bf16 %v1654_v62, %v1652_v30  ;;  %v1587_v52 = vpop.f32.mrb[45].mxu1  ;;  %v1586_v45 = vadd.f32 %v1585_v23, %v3258_v53  ;;  %v3264_v30 = vld [vmem:[#allocation13_spill] sm:$0xff]  ;;  %v3265_v23 = vld [vmem:[#allocation14_spill] sm:$0xff] }
 0x5ac   : > { %v2131_v16 = vpack.c.bf16 %v1655_v56, %v1653_v4  ;;  %v1588_v46 = vadd.f32 %v1587_v52, %v3258_v53 }
 0x5ad   : > { %v1656_v36 = vmax.f32 %v1586_v45, 0.0 }
 0x5ae   : > { %v1591_v27 = vpop.f32.mrb[46].mxu1  ;;  %2132 = vmatprep.subr.bf16.mxu0 %v2131_v16  ;;  %v1657_v37 = vmax.f32 %v1588_v46, 0.0 }
 0x5af   : > { %v1592_v28 = vadd.f32 %v1591_v27, %v3259_v20  ;;  %v1593_v29 = vpop.f32.mrb[47].mxu1  ;;  %2134 = vmatpush1.bf16.msra.mxu0 %v2133_v33 }
 0x5b0   : > { %v1594_v32 = vadd.f32 %v1593_v29, %v3259_v20 }
 0x5b1   : > { %v1658_v48 = vmax.f32 %v1592_v28, 0.0 }
 0x5b2   : > { %v1659_v44 = vmax.f32 %v1594_v32, 0.0  ;;  %v1597_v50 = vpop.f32.mrb[48].mxu1 }
 0x5b3   : > { %v2137_v63 = vpack.c.bf16 %v1658_v48, %v1656_v36  ;;  %v1599_v1 = vpop.f32.mrb[49].mxu1  ;;  %v1598_v5 = vadd.f32 %v1597_v50, %v3260_v3  ;;  %v3266_v36 = vld [vmem:[#allocation15_spill] sm:$0xff]  ;;  %v3267_v50 = vld [vmem:[#allocation16_spill] sm:$0xff] }
 0x5b4   : > { %v2135_v2 = vpack.c.bf16 %v1659_v44, %v1657_v37  ;;  %v1600_v6 = vadd.f32 %v1599_v1, %v3260_v3 }
 0x5b5   : > { %v1660_v13 = vmax.f32 %v1598_v5, 0.0 }
 0x5b6   : > { %v1603_v8 = vpop.f32.mrb[50].mxu1  ;;  %2136 = vmatprep.subr.bf16.mxu0 %v2135_v2  ;;  %v1661_v17 = vmax.f32 %v1600_v6, 0.0 }
 0x5b7   : > { %v1604_v10 = vadd.f32 %v1603_v8, %v3261_v9  ;;  %v1605_v11 = vpop.f32.mrb[51].mxu1  ;;  %2138 = vmatpush1.bf16.msra.mxu0 %v2137_v63 }
 0x5b8   : > { %v1606_v12 = vadd.f32 %v1605_v11, %v3261_v9  ;;  %v3268_v11 = vld [vmem:[#allocation17_spill] sm:$0xff] }
 0x5b9   : > { %v1662_v15 = vmax.f32 %v1604_v10, 0.0 }
 0x5ba   : > { %v1663_v18 = vmax.f32 %v1606_v12, 0.0  ;;  %v1609_v21 = vpop.f32.mrb[52].mxu1  ;;  %v3269_v12 = vld [vmem:[#allocation18_spill] sm:$0xff] }
 0x5bb   : > { %v2141_v38 = vpack.c.bf16 %v1662_v15, %v1660_v13  ;;  %v1611_v24 = vpop.f32.mrb[53].mxu1  ;;  %v1610_v41 = vadd.f32 %v1609_v21, %v3262_v26  ;;  %v3270_v13 = vld [vmem:[#allocation19_spill] sm:$0xff]  ;;  %v3271_v15 = vld [vmem:[#allocation20_spill] sm:$0xff] }
 0x5bc   : > { %v2139_v39 = vpack.c.bf16 %v1663_v18, %v1661_v17  ;;  %v1612_v42 = vadd.f32 %v1611_v24, %v3262_v26  ;;  %v3272_v17 = vld [vmem:[#allocation21_spill] sm:$0xff]  ;;  %v3273_v18 = vld [vmem:[#allocation22_spill] sm:$0xff]  ;;  %v3274_v21 = vld [vmem:[#allocation23_spill] sm:$0xff] }
 0x5bd   : > { %v1664_v31 = vmax.f32 %v1610_v41, 0.0  ;;  %v3276_v26 = vld [vmem:[#allocation25_spill] sm:$0xff] }
 0x5be   : > { %v1615_v54 = vpop.f32.mrb[54].mxu1  ;;  %2140 = vmatprep.subr.bf16.mxu0 %v2139_v39  ;;  %v1665_v55 = vmax.f32 %v1612_v42, 0.0 }
 0x5bf   : > { %v1616_v14 = vadd.f32 %v1615_v54, %v3263_v34  ;;  %v1617_v59 = vpop.f32.mrb[55].mxu1  ;;  %2142 = vmatpush1.bf16.msra.mxu0 %v2141_v38  ;;  %v3275_v38 = vld [vmem:[#allocation24_spill] sm:$0xff] }
 0x5c0   : > { %v1618_v61 = vadd.f32 %v1617_v59, %v3263_v34  ;;  %v3277_v34 = vld [vmem:[#allocation26_spill] sm:$0xff] }
 0x5c1   : > { %v1666_v49 = vmax.f32 %v1616_v14, 0.0 }
 0x5c2   : > { %v1667_v7 = vmax.f32 %v1618_v61, 0.0  ;;  %v1621_v0 = vpop.f32.mrb[56].mxu1 }
 0x5c3   : > { %v2145_v57 = vpack.c.bf16 %v1666_v49, %v1664_v31  ;;  %v1623_v60 = vpop.f32.mrb[57].mxu1  ;;  %v1622_v62 = vadd.f32 %v1621_v0, %v3264_v30 }
 0x5c4   : > { %v2143_v58 = vpack.c.bf16 %v1667_v7, %v1665_v55  ;;  %v1624_v4 = vadd.f32 %v1623_v60, %v3264_v30 }
 0x5c5   : > { %v1668_v53 = vmax.f32 %v1622_v62, 0.0 }
 0x5c6   : > { %v1627_v56 = vpop.f32.mrb[58].mxu1  ;;  %2144 = vmatprep.subr.bf16.mxu0 %v2143_v58  ;;  %v1669_v46 = vmax.f32 %v1624_v4, 0.0  ;;  %v3278_v58 = vld [vmem:[#allocation27_spill] sm:$0xff] }
 0x5c7   : > { %v1628_v33 = vadd.f32 %v1627_v56, %v3265_v23  ;;  %v1629_v52 = vpop.f32.mrb[59].mxu1  ;;  %2146 = vmatpush1.bf16.msra.mxu0 %v2145_v57  ;;  %v3279_v56 = vld [vmem:[#allocation28_spill] sm:$0xff] }
 0x5c8   : > { %v1630_v16 = vadd.f32 %v1629_v52, %v3265_v23 }
 0x5c9   : > { %v1670_v45 = vmax.f32 %v1628_v33, 0.0 }
 0x5ca   : > { %v1671_v27 = vmax.f32 %v1630_v16, 0.0  ;;  %v1633_v20 = vpop.f32.mrb[60].mxu1 }
 0x5cb   : > { %v2149_v28 = vpack.c.bf16 %v1670_v45, %v1668_v53  ;;  %v1635_v29 = vpop.f32.mrb[61].mxu1  ;;  %v1634_v48 = vadd.f32 %v1633_v20, %v3266_v36 }
 0x5cc   : > { %v2147_v32 = vpack.c.bf16 %v1671_v27, %v1669_v46  ;;  %v1636_v37 = vadd.f32 %v1635_v29, %v3266_v36 }
 0x5cd   : > { %v1672_v3 = vmax.f32 %v1634_v48, 0.0 }
 0x5ce   : > { %v1639_v44 = vpop.f32.mrb[62].mxu1  ;;  %2148 = vmatprep.subr.bf16.mxu0 %v2147_v32  ;;  %v1673_v6 = vmax.f32 %v1636_v37, 0.0  ;;  %v3280_v32 = vld [vmem:[#allocation29_spill] sm:$0xff] }
 0x5cf   : > { %v1640_v63 = vadd.f32 %v1639_v44, %v3267_v50  ;;  %v1641_v1 = vpop.f32.mrb[63].mxu1  ;;  %2150 = vmatpush1.bf16.msra.mxu0 %v2149_v28 }
 0x5d0   : > { %v1642_v2 = vadd.f32 %v1641_v1, %v3267_v50 }
 0x5d1   : > { %v1674_v5 = vmax.f32 %v1640_v63, 0.0 }
 0x5d2   : > { %v1675_v8 = vmax.f32 %v1642_v2, 0.0 }
 0x5d3   : > { %v2153_v9 = vpack.c.bf16 %v1674_v5, %v1672_v3 }
 0x5d4   : > { %v2151_v10 = vpack.c.bf16 %v1675_v8, %v1673_v6 }
 0x5d6   : > { %2152 = vmatprep.subr.bf16.mxu0 %v2151_v10 }
 0x5d7   : > { %2154 = vmatpush1.bf16.msra.mxu0 %v2153_v9 }
 0x5da   : > { %1741 = vmatmul.mubr.f32.vlgmr.msra.gmra.mrb[50].mxu0 %v3268_v11 }
 0x5db   : > { %1746 = vmatprep.mubr.f32.mxu0 %v3241_v25 }
 0x5de   : > { %1747 = vmatmul.mubr.f32.gmra.mrb[52].mxu0 %v3269_v12 }
 0x5df   : > { %1752 = vmatprep.mubr.f32.mxu0 %v3241_v25 }
 0x5e2   : > { %1753 = vmatmul.mubr.f32.gmra.mrb[54].mxu0 %v3270_v13 }
 0x5e3   : > { %1758 = vmatprep.mubr.f32.mxu0 %v3241_v25 }
 0x5e6   : > { %1759 = vmatmul.mubr.f32.gmra.mrb[56].mxu0 %v3271_v15 }
 0x5e7   : > { %1764 = vmatprep.mubr.f32.mxu0 %v3241_v25 }
 0x5ea   : > { %1765 = vmatmul.mubr.f32.gmra.mrb[58].mxu0 %v3272_v17 }
 0x5eb   : > { %1770 = vmatprep.mubr.f32.mxu0 %v3241_v25 }
 0x5ee   : > { %1771 = vmatmul.mubr.f32.gmra.mrb[60].mxu0 %v3273_v18 }
 0x5ef   : > { %1776 = vmatprep.mubr.f32.mxu0 %v3241_v25 }
 0x5f2   : > { %1777 = vmatmul.mubr.f32.gmra.mrb[62].mxu0 %v3274_v21 }
 0x5f3   : > { %1782 = vmatprep.mubr.f32.mxu0 %v3241_v25 }
 0x5f6   : > { %1783 = vmatmul.mubr.f32.gmra.mrb[64].mxu0 %v3275_v38 }
 0x5f7   : > { %1869 = vmatprep.mubr.f32.mxu0 %v3241_v25 }
 0x6ad   : > { %v1742_v24 = vpop.f32.mrb[50].mxu0 }
 0x6ae   : > { %v1744_v39 = vpop.f32.mrb[51].mxu0  ;;  %v1743_v41 = vadd.f32 %v1742_v24, %v3276_v26 }
 0x6af   : > { %v1745_v42 = vadd.f32 %v1744_v39, %v3276_v26 }
 0x6b0   : > { %v1789_v31 = vmax.f32 %v1743_v41, 0.0 }
 0x6b1   : > { %v1748_v54 = vpop.f32.mrb[52].mxu0  ;;  %v1790_v55 = vmax.f32 %v1745_v42, 0.0 }
 0x6b2   : > { %v1749_v14 = vadd.f32 %v1748_v54, %v3277_v34  ;;  %v1750_v59 = vpop.f32.mrb[53].mxu0 }
 0x6b3   : > { %v1751_v61 = vadd.f32 %v1750_v59, %v3277_v34 }
 0x6b4   : > { %v1791_v49 = vmax.f32 %v1749_v14, 0.0 }
 0x6b5   : > { %v1792_v7 = vmax.f32 %v1751_v61, 0.0  ;;  %v1754_v0 = vpop.f32.mrb[54].mxu0 }
 0x6b6   : > { %v2157_v57 = vpack.c.bf16 %v1791_v49, %v1789_v31  ;;  %v1756_v60 = vpop.f32.mrb[55].mxu0  ;;  %v1755_v30 = vadd.f32 %v1754_v0, %v3278_v58 }
 0x6b7   : > { %v2155_v25 = vpack.c.bf16 %v1792_v7, %v1790_v55  ;;  %v1757_v62 = vadd.f32 %v1756_v60, %v3278_v58 }
 0x6b8   : > { %v1793_v16 = vmax.f32 %v1755_v30, 0.0 }
 0x6b9   : > { %v1760_v4 = vpop.f32.mrb[56].mxu0  ;;  %2156 = vmatprep.subr.bf16.mxu0 %v2155_v25  ;;  %v1794_v45 = vmax.f32 %v1757_v62, 0.0 }
 0x6ba   : > { %v1761_v23 = vadd.f32 %v1760_v4, %v3279_v56  ;;  %v1762_v33 = vpop.f32.mrb[57].mxu0  ;;  %2158 = vmatpush1.bf16.msra.mxu0 %v2157_v57 }
 0x6bb   : > { %v1763_v52 = vadd.f32 %v1762_v33, %v3279_v56 }
 0x6bc   : > { %v1795_v53 = vmax.f32 %v1761_v23, 0.0 }
 0x6bd   : > { %v1796_v46 = vmax.f32 %v1763_v52, 0.0  ;;  %v1766_v27 = vpop.f32.mrb[58].mxu0 }
 0x6be   : > { %v2161_v20 = vpack.c.bf16 %v1795_v53, %v1793_v16  ;;  %v1768_v28 = vpop.f32.mrb[59].mxu0  ;;  %v1767_v36 = vadd.f32 %v1766_v27, %v3280_v32 }
 0x6bf   : > { %v2159_v29 = vpack.c.bf16 %v1796_v46, %v1794_v45  ;;  %v1769_v48 = vadd.f32 %v1768_v28, %v3280_v32 }
 0x6c0   : > { %v1797_v1 = vmax.f32 %v1767_v36, 0.0 }
 0x6c1   : > { %v1772_v37 = vpop.f32.mrb[60].mxu0  ;;  %2160 = vmatprep.subr.bf16.mxu0 %v2159_v29  ;;  %v1798_v3 = vmax.f32 %v1769_v48, 0.0 }
 0x6c2   : > { %v1773_v44 = vadd.f32 %v1772_v37, %v2913_v51  ;;  %v1774_v50 = vpop.f32.mrb[61].mxu0  ;;  %2162 = vmatpush1.bf16.msra.mxu0 %v2161_v20 }
 0x6c3   : > { %v1775_v63 = vadd.f32 %v1774_v50, %v2913_v51 }
 0x6c4   : > { %v1799_v2 = vmax.f32 %v1773_v44, 0.0 }
 0x6c5   : > { %v1800_v5 = vmax.f32 %v1775_v63, 0.0  ;;  %v1778_v6 = vpop.f32.mrb[62].mxu0 }
 0x6c6   : > { %v2165_v8 = vpack.c.bf16 %v1799_v2, %v1797_v1  ;;  %v1780_v9 = vpop.f32.mrb[63].mxu0  ;;  %v1779_v11 = vadd.f32 %v1778_v6, %v2918_v19 }
 0x6c7   : > { %v2163_v10 = vpack.c.bf16 %v1800_v5, %v1798_v3  ;;  %v1781_v12 = vadd.f32 %v1780_v9, %v2918_v19 }
 0x6c8   : > { %v1801_v18 = vmax.f32 %v1779_v11, 0.0 }
 0x6c9   : > { %v1784_v13 = vpop.f32.mrb[64].mxu0  ;;  %2164 = vmatprep.subr.bf16.mxu0 %v2163_v10  ;;  %v1802_v38 = vmax.f32 %v1781_v12, 0.0 }
 0x6ca   : > { %v1785_v15 = vadd.f32 %v1784_v13, %v2921_v43  ;;  %v1786_v17 = vpop.f32.mrb[65].mxu0  ;;  %2166 = vmatpush1.bf16.msra.mxu0 %v2165_v8 }
 0x6cb   : > { %v1787_v51 = vadd.f32 %v1786_v17, %v2921_v43 }
 0x6cc   : > { %v1803_v21 = vmax.f32 %v1785_v15, 0.0 }
 0x6cd   : > { %v1804_v24 = vmax.f32 %v1787_v51, 0.0 }
 0x6ce   : > { %v2169_v39 = vpack.c.bf16 %v1803_v21, %v1801_v18 }
 0x6cf   : > { %v2167_v26 = vpack.c.bf16 %v1804_v24, %v1802_v38 }
 0x6d1   : > { %2168 = vmatprep.subr.bf16.mxu0 %v2167_v26 }
 0x6d2   : > { %2170 = vmatpush1.bf16.msra.mxu0 %v2169_v39 }
 0x6d5   : > { %2027 = vmatmul.mubr.msk.f32.vlgmr.msra.gmra.mrb[66].mxu0 %vm800_vm2, %v2929_v22 }
 0x7a8   : > { %v1871_v19 = vpop.f32.mrb[66].mxu0 }
 0x7a9   : > { %v1872_v41 = vadd.f32 %v1871_v19, %v2965_v35  ;;  %v1873_v42 = vpop.f32.mrb[67].mxu0 }
 0x7aa   : > { %v1874_v43 = vadd.f32 %v1873_v42, %v2965_v35 }
 0x7ac   : > { %v1878_v54 = vcombine.low %v1872_v41, %v1874_v43 }
 0x7ae   : > { %v1885_v34 = vrot.slane %v1878_v54, %v2971_v40 }
 0x7b0   : > { %v1892_v14 = vrot.slane %v1885_v34, %v2971_v40 }
 0x7b2   : > { %2028 = vst.msk [vmem:[%s2984_s26 + $0x2] sm:$0x3] %vm2977_vm3, %v1892_v14 }
 0x7b3   : > { %2228 = shalt.err (!%p2225_p3)
}
 0x7b4   : > { %s2229_s16 = scalar_lea.hbm %s3125_s17, 64  ;;  %s2233_s13 = scalar_lea.hbm %s3183_s11, 128 }
 0x7b5   : > { %p2230_p4 = scmp.ne.s32.totalorder %s3125_s17, %s2229_s16  ;;  %p2234_p9 = scmp.lt.u32.totalorder %s3125_s17, %s3183_s11 }
 0x7b6   : > { %p2235_p10 = scmp.lt.u32.totalorder %s2233_s13, %s2229_s16  ;;  %p2237_p12 = scmp.lt.u32.totalorder %s2229_s16, %s3125_s17 }
 0x7b7   : > { %p2231_p7 = pnand %p2230_p4, %p2384_p5 }
 0x7b8   : > { %p2236_p11 = por %p2235_p10, %p2234_p9 }
 0x7b9   : > { %p2232_p8 = pneg %p2231_p7 }
 0x7ba   : > { %p2238_p13 = por %p2237_p12, %p2236_p11 }
 0x7bc   : > { %p2239_p0 = pnand %p2238_p13, %p2232_p8 }
 0x7be   : > { %2242 = shalt.err (!%p2239_p0)
}
 0x7bf   : > { %2171 = dma.vmem_to_hbm [thread:$0]  (%p2384_p5), %s3127_s12, 64, %s3125_s17, %s1897_s10  }
 0x7c0 PF: > { %p2177_p1 = scmp.ge.s32.totalorder %s2277_s22, 2  ;;  %s1923_s18 = sand.u32 1, %s2265_s19  }
 0x7c1   : > { %s1924_s25 = scalar_lea.sflag [#allocation4], %s1923_s18 }
 0x7c2   : > { %p2174_p2 = pnand %p2177_p1, %p2388_p6 }
 0x7c4   : > { %2260 = dma.done.wait (!%p2174_p2), %s1924_s25, 64  }
 0x7c5   : > { %2262 = vsyncadd (!%p2174_p2), %s1924_s25, 4294967232  ;;  %p23_p3 = scmp.ge.s32.totalorder %s2371_s24, 4   ;;  %s3281_s19 = smov %s2269_s20 }
 0x7c6   : > { %s3282_s20 = smov %s2273_s21  ;;  %s3283_s21 = smov %s2382_s27 }
 0x7c7   : > { %s3284_s22 = smov %s2371_s24  ;;  %25 = sbr.rel (!%p23_p3) target bundleno = 6 (0x6), region = 101 }
 0x7ce   :  { %1929 = vsyncpa [#allocation4], 1 }
 0x7cf   :  { %1931 = vsyncpa [#allocation4 + $0x1], 1 }

</bundles_post_ra>
